<compile_context>
chip_gen: v7x
topology: tpu7x:2x2x1
jax: 0.10.0
libtpu: 0.0.40
codegen_flags: <defaults>
</compile_context>

<pallas_src>
import jax
import jax.numpy as jnp
from jax import lax
from jax.experimental import pallas as pl
from jax.experimental.pallas import tpu as pltpu

# ---------------- model hyper-parameters (small, synthetic) ----------------
VOCAB = 64
SEQ = 8
HIDDEN = 32
N_HEADS = 4
HEAD_DIM = HIDDEN // N_HEADS
N_LAYERS = 2
MLP_DIM = 4 * HIDDEN
LN_EPS = 1e-5


# ----------------------------- fused Pallas kernel --------------------------
def _gpt_forward_kernel(tok_ref, wte_ref, wpe_ref,
                        ln1g_ref, ln1b_ref, wqkv_ref, bqkv_ref,
                        wao_ref, bao_ref, ln2g_ref, ln2b_ref,
                        wfc_ref, bfc_ref, wmp_ref, bmp_ref,
                        lnfg_ref, lnfb_ref, logits_ref):
    M = tok_ref.shape[0]            # B * T
    T, C = wpe_ref.shape
    B = M // T
    H, D = N_HEADS, HEAD_DIM
    scale = 1.0 / (D ** 0.5)

    wte = wte_ref[...]              # (VOCAB, C) — reused by embedding + LM head

    # ---- embeddings: exact gather as one-hot @ wte on the MXU --------------
    tok = tok_ref[...]                                            # (M, 1) int32
    vocab_ids = lax.broadcasted_iota(jnp.int32, (M, VOCAB), 1)    # (M, VOCAB)
    onehot = (vocab_ids == tok).astype(jnp.float32)
    x = jnp.dot(onehot, wte, preferred_element_type=jnp.float32)  # (M, C)
    x = x + jnp.concatenate([wpe_ref[...]] * B, axis=0)           # + positional

    # ---- causal additive bias, built once per kernel ------------------------
    row = lax.broadcasted_iota(jnp.int32, (T, T), 0)
    col = lax.broadcasted_iota(jnp.int32, (T, T), 1)
    causal_bias = jnp.where(col <= row,
                            jnp.float32(0.0), jnp.float32(-1e9))[None]  # (1,T,T)

    def layer_norm(h, g, b):
        mu = jnp.mean(h, axis=-1, keepdims=True)
        var = jnp.mean((h - mu) ** 2, axis=-1, keepdims=True)
        return (h - mu) * lax.rsqrt(var + LN_EPS) * g + b

    def gelu_new(y):
        return 0.5 * y * (1.0 + jnp.tanh(0.7978845608028654 *
                                         (y + 0.044715 * y * y * y)))

    for l in range(N_LAYERS):
        # --- attention sub-block (LN1 fused into QKV matmul) ---
        hn = layer_norm(x, ln1g_ref[l], ln1b_ref[l])
        qkv = jnp.dot(hn, wqkv_ref[l],
                      preferred_element_type=jnp.float32) + bqkv_ref[l]   # (M, 3C)
        q3 = qkv[:, 0 * C:1 * C].reshape(B, T, C)
        k3 = qkv[:, 1 * C:2 * C].reshape(B, T, C)
        v3 = qkv[:, 2 * C:3 * C].reshape(B, T, C)

        head_outs = []
        for h in range(H):
            sl = slice(h * D, (h + 1) * D)
            qh, kh, vh = q3[:, :, sl], k3[:, :, sl], v3[:, :, sl]   # (B, T, D)
            s = jnp.einsum("bqd,bkd->bqk", qh, kh,
                           preferred_element_type=jnp.float32) * scale
            s = s + causal_bias
            s = s - jnp.max(s, axis=-1, keepdims=True)
            p = jnp.exp(s)
            p = p * pl.reciprocal(jnp.sum(p, axis=-1, keepdims=True), approx=True)
            head_outs.append(jnp.einsum("bqk,bkd->bqd", p, vh,
                                        preferred_element_type=jnp.float32))
        attn = jnp.concatenate(head_outs, axis=-1).reshape(M, C)    # (M, C)
        attn = jnp.dot(attn, wao_ref[l],
                       preferred_element_type=jnp.float32) + bao_ref[l]
        x = x + attn

        # --- MLP sub-block (LN2 fused into FC matmul, GELU + bias fused) ---
        hn = layer_norm(x, ln2g_ref[l], ln2b_ref[l])
        m = jnp.dot(hn, wfc_ref[l],
                    preferred_element_type=jnp.float32) + bfc_ref[l]
        m = gelu_new(m)
        m = jnp.dot(m, wmp_ref[l],
                    preferred_element_type=jnp.float32) + bmp_ref[l]
        x = x + m

    # ---- final LN + tied LM head (contract last dims, no transpose, no bias) ----
    hf = layer_norm(x, lnfg_ref[...], lnfb_ref[...])
    logits = lax.dot_general(hf, wte, (((1,), (1,)), ((), ())),
                             preferred_element_type=jnp.float32)    # (M, VOCAB)
    logits_ref[...] = logits.astype(logits_ref.dtype)


def _full_spec(shape):
    zeros = (0,) * len(shape)
    return pl.BlockSpec(shape, lambda i, zeros=zeros: zeros)


# ------------------------------ parameters ----------------------------------
def init_params(key):
    std = 0.02
    keys = jax.random.split(key, 6)
    L, C, F = N_LAYERS, HIDDEN, MLP_DIM
    return {
        "wte": jax.random.normal(keys[0], (VOCAB, C), jnp.float32) * std,
        "wpe": jax.random.normal(keys[1], (SEQ, C), jnp.float32) * std,
        "ln1_g": jnp.ones((L, 1, C), jnp.float32),
        "ln1_b": jnp.zeros((L, 1, C), jnp.float32),
        "w_qkv": jax.random.normal(keys[2], (L, C, 3 * C), jnp.float32) * std,
        "b_qkv": jnp.zeros((L, 1, 3 * C), jnp.float32),
        "w_ao": jax.random.normal(keys[3], (L, C, C), jnp.float32) * std,
        "b_ao": jnp.zeros((L, 1, C), jnp.float32),
        "ln2_g": jnp.ones((L, 1, C), jnp.float32),
        "ln2_b": jnp.zeros((L, 1, C), jnp.float32),
        "w_fc": jax.random.normal(keys[4], (L, C, F), jnp.float32) * std,
        "b_fc": jnp.zeros((L, 1, F), jnp.float32),
        "w_mp": jax.random.normal(keys[5], (L, F, C), jnp.float32) * std,
        "b_mp": jnp.zeros((L, 1, C), jnp.float32),
        "lnf_g": jnp.ones((1, C), jnp.float32),
        "lnf_b": jnp.zeros((1, C), jnp.float32),
    }


# ------------------------------ GPT-2 forward --------------------------------
def gpt_module_forward(params, tokens):
    """GPTModule.forward: returns logits of shape (B, T, VOCAB)."""
    B, T = tokens.shape
    M = B * T
    tok = tokens.reshape(M, 1).astype(jnp.int32)
    args = (tok, params["wte"], params["wpe"][:T],
            params["ln1_g"], params["ln1_b"], params["w_qkv"], params["b_qkv"],
            params["w_ao"], params["b_ao"], params["ln2_g"], params["ln2_b"],
            params["w_fc"], params["b_fc"], params["w_mp"], params["b_mp"],
            params["lnf_g"], params["lnf_b"])
    logits = pl.pallas_call(
        _gpt_forward_kernel,
        out_shape=jax.ShapeDtypeStruct((M, VOCAB), jnp.float32),
        grid=(1,),
        in_specs=[_full_spec(a.shape) for a in args],
        out_specs=_full_spec((M, VOCAB)),
        compiler_params=pltpu.CompilerParams(
            dimension_semantics=("arbitrary",)),
    )(*args)
    return logits.reshape(B, T, VOCAB)


# TODO(synk): GPTModule.loss (flattened cross-entropy) is not part of forward();
# it can be computed in plain JAX from the returned logits if needed.


if __name__ == "__main__":
    key = jax.random.PRNGKey(0)
    pkey, tkey = jax.random.split(key)
    params = init_params(pkey)

    B = 2
    tokens = jax.random.randint(tkey, (B, SEQ), 0, VOCAB, dtype=jnp.int32)

    logits = jax.jit(gpt_module_forward)(params, tokens)
    jax.block_until_ready(logits)

    assert logits.shape == (B, SEQ, VOCAB)
    assert bool(jnp.all(jnp.isfinite(logits)))
    print("KERNEL_OK")
</pallas_src>

<mosaic_0001>
module attributes {stable_mosaic.version = 11 : i64} {
  func.func @_gpt_forward_kernel(%arg0: i32, %arg1: memref<16x1xi32, #tpu.memory_space<vmem>>, %arg2: memref<64x32xf32, #tpu.memory_space<vmem>>, %arg3: memref<8x32xf32, #tpu.memory_space<vmem>>, %arg4: memref<2x1x32xf32, #tpu.memory_space<vmem>>, %arg5: memref<2x1x32xf32, #tpu.memory_space<vmem>>, %arg6: memref<2x32x96xf32, #tpu.memory_space<vmem>>, %arg7: memref<2x1x96xf32, #tpu.memory_space<vmem>>, %arg8: memref<2x32x32xf32, #tpu.memory_space<vmem>>, %arg9: memref<2x1x32xf32, #tpu.memory_space<vmem>>, %arg10: memref<2x1x32xf32, #tpu.memory_space<vmem>>, %arg11: memref<2x1x32xf32, #tpu.memory_space<vmem>>, %arg12: memref<2x32x128xf32, #tpu.memory_space<vmem>>, %arg13: memref<2x1x128xf32, #tpu.memory_space<vmem>>, %arg14: memref<2x128x32xf32, #tpu.memory_space<vmem>>, %arg15: memref<2x1x32xf32, #tpu.memory_space<vmem>>, %arg16: memref<1x32xf32, #tpu.memory_space<vmem>>, %arg17: memref<1x32xf32, #tpu.memory_space<vmem>>, %arg18: memref<16x64xf32, #tpu.memory_space<vmem>>) attributes {dimension_semantics = [#tpu.dimension_semantics<arbitrary>], iteration_bounds = array<i64: 1>, scalar_prefetch = 0 : i64, scratch_operands = 0 : i64, tpu.core_type = #tpu.core_type<tc>, window_params = [{pipeline_mode = #tpu.pipeline_mode<synchronous>, transform_indices = @transform_0, window_bounds = array<i64: 16, 1>}, {pipeline_mode = #tpu.pipeline_mode<synchronous>, transform_indices = @transform_1, window_bounds = array<i64: 64, 32>}, {pipeline_mode = #tpu.pipeline_mode<synchronous>, transform_indices = @transform_2, window_bounds = array<i64: 8, 32>}, {pipeline_mode = #tpu.pipeline_mode<synchronous>, transform_indices = @transform_3, window_bounds = array<i64: 2, 1, 32>}, {pipeline_mode = #tpu.pipeline_mode<synchronous>, transform_indices = @transform_4, window_bounds = array<i64: 2, 1, 32>}, {pipeline_mode = #tpu.pipeline_mode<synchronous>, transform_indices = @transform_5, window_bounds = array<i64: 2, 32, 96>}, {pipeline_mode = #tpu.pipeline_mode<synchronous>, transform_indices = @transform_6, window_bounds = array<i64: 2, 1, 96>}, {pipeline_mode = #tpu.pipeline_mode<synchronous>, transform_indices = @transform_7, window_bounds = array<i64: 2, 32, 32>}, {pipeline_mode = #tpu.pipeline_mode<synchronous>, transform_indices = @transform_8, window_bounds = array<i64: 2, 1, 32>}, {pipeline_mode = #tpu.pipeline_mode<synchronous>, transform_indices = @transform_9, window_bounds = array<i64: 2, 1, 32>}, {pipeline_mode = #tpu.pipeline_mode<synchronous>, transform_indices = @transform_10, window_bounds = array<i64: 2, 1, 32>}, {pipeline_mode = #tpu.pipeline_mode<synchronous>, transform_indices = @transform_11, window_bounds = array<i64: 2, 32, 128>}, {pipeline_mode = #tpu.pipeline_mode<synchronous>, transform_indices = @transform_12, window_bounds = array<i64: 2, 1, 128>}, {pipeline_mode = #tpu.pipeline_mode<synchronous>, transform_indices = @transform_13, window_bounds = array<i64: 2, 128, 32>}, {pipeline_mode = #tpu.pipeline_mode<synchronous>, transform_indices = @transform_14, window_bounds = array<i64: 2, 1, 32>}, {pipeline_mode = #tpu.pipeline_mode<synchronous>, transform_indices = @transform_15, window_bounds = array<i64: 1, 32>}, {pipeline_mode = #tpu.pipeline_mode<synchronous>, transform_indices = @transform_16, window_bounds = array<i64: 1, 32>}, {pipeline_mode = #tpu.pipeline_mode<synchronous>, transform_indices = @transform_17, window_bounds = array<i64: 16, 64>}]} {
    %c0 = arith.constant 0 : index
    %c0_0 = arith.constant 0 : index
    %0 = vector.load %arg2[%c0, %c0_0] : memref<64x32xf32, #tpu.memory_space<vmem>>, vector<64x32xf32>
    %c0_1 = arith.constant 0 : index
    %c0_2 = arith.constant 0 : index
    %1 = vector.load %arg1[%c0_1, %c0_2] : memref<16x1xi32, #tpu.memory_space<vmem>>, vector<16x1xi32>
    %2 = tpu.iota {dimensions = array<i32: 1>} : vector<16x64xi32>
    %3 = vector.broadcast %1 : vector<16x1xi32> to vector<16x64xi32>
    %4 = arith.cmpi eq, %2, %3 : vector<16x64xi32>
    %5 = arith.extui %4 : vector<16x64xi1> to vector<16x64xi32>
    %6 = arith.sitofp %5 : vector<16x64xi32> to vector<16x64xf32>
    %cst = arith.constant dense<0.000000e+00> : vector<16x32xf32>
    %7 = tpu.matmul %6, %0, %cst {dimension_numbers = #tpu.dot_dimension_numbers<[1], [0], [0], [1], [0, 0, 1, 1], [], []>} : vector<16x64xf32>, vector<64x32xf32>, vector<16x32xf32> -> vector<16x32xf32>
    %c0_3 = arith.constant 0 : index
    %c0_4 = arith.constant 0 : index
    %8 = vector.load %arg3[%c0_3, %c0_4] : memref<8x32xf32, #tpu.memory_space<vmem>>, vector<8x32xf32>
    %9 = tpu.concatenate %8, %8 in 0 : vector<8x32xf32>, vector<8x32xf32> -> vector<16x32xf32>
    %10 = arith.addf %7, %9 : vector<16x32xf32>
    %11 = tpu.iota {dimensions = array<i32: 0>} : vector<8x8xi32>
    %12 = tpu.iota {dimensions = array<i32: 1>} : vector<8x8xi32>
    %13 = arith.cmpi sle, %12, %11 : vector<8x8xi32>
    %cst_5 = arith.constant 0.000000e+00 : f32
    %cst_6 = arith.constant -1.000000e+09 : f32
    %14 = vector.broadcast %cst_5 : f32 to vector<8x8xf32>
    %15 = vector.broadcast %cst_6 : f32 to vector<8x8xf32>
    %16 = arith.select %13, %14, %15 : vector<8x8xi1>, vector<8x8xf32>
    %17 = vector.shape_cast %16 : vector<8x8xf32> to vector<1x8x8xf32>
    %c0_7 = arith.constant 0 : index
    %c0_8 = arith.constant 0 : index
    %c0_9 = arith.constant 0 : index
    %18 = vector.load %arg4[%c0_7, %c0_8, %c0_9] : memref<2x1x32xf32, #tpu.memory_space<vmem>>, vector<1x1x32xf32>
    %19 = vector.shape_cast %18 : vector<1x1x32xf32> to vector<1x32xf32>
    %c0_10 = arith.constant 0 : index
    %c0_11 = arith.constant 0 : index
    %c0_12 = arith.constant 0 : index
    %20 = vector.load %arg5[%c0_10, %c0_11, %c0_12] : memref<2x1x32xf32, #tpu.memory_space<vmem>>, vector<1x1x32xf32>
    %21 = vector.shape_cast %20 : vector<1x1x32xf32> to vector<1x32xf32>
    %cst_13 = arith.constant dense<0.000000e+00> : vector<16xf32>
    %22 = vector.multi_reduction <add>, %10, %cst_13 [1] : vector<16x32xf32> to vector<16xf32>
    %23 = vector.shape_cast %22 : vector<16xf32> to vector<16x1xf32>
    %cst_14 = arith.constant 3.200000e+01 : f32
    %24 = vector.broadcast %cst_14 : f32 to vector<16x1xf32>
    %25 = arith.divf %23, %24 : vector<16x1xf32>
    %26 = vector.broadcast %25 : vector<16x1xf32> to vector<16x32xf32>
    %27 = arith.subf %10, %26 : vector<16x32xf32>
    %28 = arith.mulf %27, %27 : vector<16x32xf32>
    %cst_15 = arith.constant dense<0.000000e+00> : vector<16xf32>
    %29 = vector.multi_reduction <add>, %28, %cst_15 [1] : vector<16x32xf32> to vector<16xf32>
    %30 = vector.shape_cast %29 : vector<16xf32> to vector<16x1xf32>
    %cst_16 = arith.constant 3.200000e+01 : f32
    %31 = vector.broadcast %cst_16 : f32 to vector<16x1xf32>
    %32 = arith.divf %30, %31 : vector<16x1xf32>
    %33 = vector.broadcast %25 : vector<16x1xf32> to vector<16x32xf32>
    %34 = arith.subf %10, %33 : vector<16x32xf32>
    %cst_17 = arith.constant 9.99999974E-6 : f32
    %35 = vector.broadcast %cst_17 : f32 to vector<16x1xf32>
    %36 = arith.addf %32, %35 : vector<16x1xf32>
    %37 = math.rsqrt %36 : vector<16x1xf32>
    %38 = vector.broadcast %37 : vector<16x1xf32> to vector<16x32xf32>
    %39 = arith.mulf %34, %38 : vector<16x32xf32>
    %40 = vector.broadcast %19 : vector<1x32xf32> to vector<16x32xf32>
    %41 = arith.mulf %39, %40 : vector<16x32xf32>
    %42 = vector.broadcast %21 : vector<1x32xf32> to vector<16x32xf32>
    %43 = arith.addf %41, %42 : vector<16x32xf32>
    %c0_18 = arith.constant 0 : index
    %c0_19 = arith.constant 0 : index
    %c0_20 = arith.constant 0 : index
    %44 = vector.load %arg6[%c0_18, %c0_19, %c0_20] : memref<2x32x96xf32, #tpu.memory_space<vmem>>, vector<1x32x96xf32>
    %45 = vector.shape_cast %44 : vector<1x32x96xf32> to vector<32x96xf32>
    %cst_21 = arith.constant dense<0.000000e+00> : vector<16x96xf32>
    %46 = tpu.matmul %43, %45, %cst_21 {dimension_numbers = #tpu.dot_dimension_numbers<[1], [0], [0], [1], [0, 0, 1, 1], [], []>} : vector<16x32xf32>, vector<32x96xf32>, vector<16x96xf32> -> vector<16x96xf32>
    %c0_22 = arith.constant 0 : index
    %c0_23 = arith.constant 0 : index
    %c0_24 = arith.constant 0 : index
    %47 = vector.load %arg7[%c0_22, %c0_23, %c0_24] : memref<2x1x96xf32, #tpu.memory_space<vmem>>, vector<1x1x96xf32>
    %48 = vector.shape_cast %47 : vector<1x1x96xf32> to vector<1x96xf32>
    %49 = vector.broadcast %48 : vector<1x96xf32> to vector<16x96xf32>
    %50 = arith.addf %46, %49 : vector<16x96xf32>
    %51 = vector.extract_strided_slice %50 {offsets = [0, 0], sizes = [16, 32], strides = [1, 1]} : vector<16x96xf32> to vector<16x32xf32>
    %52 = vector.shape_cast %51 : vector<16x32xf32> to vector<2x8x32xf32>
    %53 = vector.extract_strided_slice %50 {offsets = [0, 32], sizes = [16, 32], strides = [1, 1]} : vector<16x96xf32> to vector<16x32xf32>
    %54 = vector.shape_cast %53 : vector<16x32xf32> to vector<2x8x32xf32>
    %55 = vector.extract_strided_slice %50 {offsets = [0, 64], sizes = [16, 32], strides = [1, 1]} : vector<16x96xf32> to vector<16x32xf32>
    %56 = vector.shape_cast %55 : vector<16x32xf32> to vector<2x8x32xf32>
    %57 = vector.extract_strided_slice %52 {offsets = [0, 0, 0], sizes = [2, 8, 8], strides = [1, 1, 1]} : vector<2x8x32xf32> to vector<2x8x8xf32>
    %58 = vector.extract_strided_slice %54 {offsets = [0, 0, 0], sizes = [2, 8, 8], strides = [1, 1, 1]} : vector<2x8x32xf32> to vector<2x8x8xf32>
    %59 = vector.extract_strided_slice %56 {offsets = [0, 0, 0], sizes = [2, 8, 8], strides = [1, 1, 1]} : vector<2x8x32xf32> to vector<2x8x8xf32>
    "tpu.trace_start"() <{level = 10 : i32, message = "bqd,bkd->bqk"}> : () -> ()
    %cst_25 = arith.constant dense<0.000000e+00> : vector<2x8x8xf32>
    %60 = tpu.matmul %57, %58, %cst_25 {dimension_numbers = #tpu.dot_dimension_numbers<[2], [2], [1], [1], [0, 0, 0, 1, 1, 1], [0], [0]>} : vector<2x8x8xf32>, vector<2x8x8xf32>, vector<2x8x8xf32> -> vector<2x8x8xf32>
    "tpu.trace_stop"() : () -> ()
    %cst_26 = arith.constant 0.353553385 : f32
    %61 = vector.broadcast %cst_26 : f32 to vector<2x8x8xf32>
    %62 = arith.mulf %60, %61 : vector<2x8x8xf32>
    %63 = vector.broadcast %17 : vector<1x8x8xf32> to vector<2x8x8xf32>
    %64 = arith.addf %62, %63 : vector<2x8x8xf32>
    %cst_27 = arith.constant dense<0xFF800000> : vector<2x8xf32>
    %65 = vector.multi_reduction <maximumf>, %64, %cst_27 [2] : vector<2x8x8xf32> to vector<2x8xf32>
    %66 = vector.shape_cast %65 : vector<2x8xf32> to vector<2x8x1xf32>
    %67 = vector.broadcast %66 : vector<2x8x1xf32> to vector<2x8x8xf32>
    %68 = arith.subf %64, %67 : vector<2x8x8xf32>
    %69 = math.exp %68 : vector<2x8x8xf32>
    %cst_28 = arith.constant dense<0.000000e+00> : vector<2x8xf32>
    %70 = vector.multi_reduction <add>, %69, %cst_28 [2] : vector<2x8x8xf32> to vector<2x8xf32>
    %71 = vector.shape_cast %70 : vector<2x8xf32> to vector<2x8x1xf32>
    %72 = tpu.reciprocal %71 {approx = true} : vector<2x8x1xf32> -> vector<2x8x1xf32>
    %73 = vector.broadcast %72 : vector<2x8x1xf32> to vector<2x8x8xf32>
    %74 = arith.mulf %69, %73 : vector<2x8x8xf32>
    "tpu.trace_start"() <{level = 10 : i32, message = "bqk,bkd->bqd"}> : () -> ()
    %cst_29 = arith.constant dense<0.000000e+00> : vector<2x8x8xf32>
    %75 = tpu.matmul %74, %59, %cst_29 {dimension_numbers = #tpu.dot_dimension_numbers<[2], [1], [1], [2], [0, 0, 0, 1, 1, 2], [0], [0]>} : vector<2x8x8xf32>, vector<2x8x8xf32>, vector<2x8x8xf32> -> vector<2x8x8xf32>
    "tpu.trace_stop"() : () -> ()
    %76 = vector.extract_strided_slice %52 {offsets = [0, 0, 8], sizes = [2, 8, 8], strides = [1, 1, 1]} : vector<2x8x32xf32> to vector<2x8x8xf32>
    %77 = vector.extract_strided_slice %54 {offsets = [0, 0, 8], sizes = [2, 8, 8], strides = [1, 1, 1]} : vector<2x8x32xf32> to vector<2x8x8xf32>
    %78 = vector.extract_strided_slice %56 {offsets = [0, 0, 8], sizes = [2, 8, 8], strides = [1, 1, 1]} : vector<2x8x32xf32> to vector<2x8x8xf32>
    "tpu.trace_start"() <{level = 10 : i32, message = "bqd,bkd->bqk"}> : () -> ()
    %cst_30 = arith.constant dense<0.000000e+00> : vector<2x8x8xf32>
    %79 = tpu.matmul %76, %77, %cst_30 {dimension_numbers = #tpu.dot_dimension_numbers<[2], [2], [1], [1], [0, 0, 0, 1, 1, 1], [0], [0]>} : vector<2x8x8xf32>, vector<2x8x8xf32>, vector<2x8x8xf32> -> vector<2x8x8xf32>
    "tpu.trace_stop"() : () -> ()
    %cst_31 = arith.constant 0.353553385 : f32
    %80 = vector.broadcast %cst_31 : f32 to vector<2x8x8xf32>
    %81 = arith.mulf %79, %80 : vector<2x8x8xf32>
    %82 = vector.broadcast %17 : vector<1x8x8xf32> to vector<2x8x8xf32>
    %83 = arith.addf %81, %82 : vector<2x8x8xf32>
    %cst_32 = arith.constant dense<0xFF800000> : vector<2x8xf32>
    %84 = vector.multi_reduction <maximumf>, %83, %cst_32 [2] : vector<2x8x8xf32> to vector<2x8xf32>
    %85 = vector.shape_cast %84 : vector<2x8xf32> to vector<2x8x1xf32>
    %86 = vector.broadcast %85 : vector<2x8x1xf32> to vector<2x8x8xf32>
    %87 = arith.subf %83, %86 : vector<2x8x8xf32>
    %88 = math.exp %87 : vector<2x8x8xf32>
    %cst_33 = arith.constant dense<0.000000e+00> : vector<2x8xf32>
    %89 = vector.multi_reduction <add>, %88, %cst_33 [2] : vector<2x8x8xf32> to vector<2x8xf32>
    %90 = vector.shape_cast %89 : vector<2x8xf32> to vector<2x8x1xf32>
    %91 = tpu.reciprocal %90 {approx = true} : vector<2x8x1xf32> -> vector<2x8x1xf32>
    %92 = vector.broadcast %91 : vector<2x8x1xf32> to vector<2x8x8xf32>
    %93 = arith.mulf %88, %92 : vector<2x8x8xf32>
    "tpu.trace_start"() <{level = 10 : i32, message = "bqk,bkd->bqd"}> : () -> ()
    %cst_34 = arith.constant dense<0.000000e+00> : vector<2x8x8xf32>
    %94 = tpu.matmul %93, %78, %cst_34 {dimension_numbers = #tpu.dot_dimension_numbers<[2], [1], [1], [2], [0, 0, 0, 1, 1, 2], [0], [0]>} : vector<2x8x8xf32>, vector<2x8x8xf32>, vector<2x8x8xf32> -> vector<2x8x8xf32>
    "tpu.trace_stop"() : () -> ()
    %95 = vector.extract_strided_slice %52 {offsets = [0, 0, 16], sizes = [2, 8, 8], strides = [1, 1, 1]} : vector<2x8x32xf32> to vector<2x8x8xf32>
    %96 = vector.extract_strided_slice %54 {offsets = [0, 0, 16], sizes = [2, 8, 8], strides = [1, 1, 1]} : vector<2x8x32xf32> to vector<2x8x8xf32>
    %97 = vector.extract_strided_slice %56 {offsets = [0, 0, 16], sizes = [2, 8, 8], strides = [1, 1, 1]} : vector<2x8x32xf32> to vector<2x8x8xf32>
    "tpu.trace_start"() <{level = 10 : i32, message = "bqd,bkd->bqk"}> : () -> ()
    %cst_35 = arith.constant dense<0.000000e+00> : vector<2x8x8xf32>
    %98 = tpu.matmul %95, %96, %cst_35 {dimension_numbers = #tpu.dot_dimension_numbers<[2], [2], [1], [1], [0, 0, 0, 1, 1, 1], [0], [0]>} : vector<2x8x8xf32>, vector<2x8x8xf32>, vector<2x8x8xf32> -> vector<2x8x8xf32>
    "tpu.trace_stop"() : () -> ()
    %cst_36 = arith.constant 0.353553385 : f32
    %99 = vector.broadcast %cst_36 : f32 to vector<2x8x8xf32>
    %100 = arith.mulf %98, %99 : vector<2x8x8xf32>
    %101 = vector.broadcast %17 : vector<1x8x8xf32> to vector<2x8x8xf32>
    %102 = arith.addf %100, %101 : vector<2x8x8xf32>
    %cst_37 = arith.constant dense<0xFF800000> : vector<2x8xf32>
    %103 = vector.multi_reduction <maximumf>, %102, %cst_37 [2] : vector<2x8x8xf32> to vector<2x8xf32>
    %104 = vector.shape_cast %103 : vector<2x8xf32> to vector<2x8x1xf32>
    %105 = vector.broadcast %104 : vector<2x8x1xf32> to vector<2x8x8xf32>
    %106 = arith.subf %102, %105 : vector<2x8x8xf32>
    %107 = math.exp %106 : vector<2x8x8xf32>
    %cst_38 = arith.constant dense<0.000000e+00> : vector<2x8xf32>
    %108 = vector.multi_reduction <add>, %107, %cst_38 [2] : vector<2x8x8xf32> to vector<2x8xf32>
    %109 = vector.shape_cast %108 : vector<2x8xf32> to vector<2x8x1xf32>
    %110 = tpu.reciprocal %109 {approx = true} : vector<2x8x1xf32> -> vector<2x8x1xf32>
    %111 = vector.broadcast %110 : vector<2x8x1xf32> to vector<2x8x8xf32>
    %112 = arith.mulf %107, %111 : vector<2x8x8xf32>
    "tpu.trace_start"() <{level = 10 : i32, message = "bqk,bkd->bqd"}> : () -> ()
    %cst_39 = arith.constant dense<0.000000e+00> : vector<2x8x8xf32>
    %113 = tpu.matmul %112, %97, %cst_39 {dimension_numbers = #tpu.dot_dimension_numbers<[2], [1], [1], [2], [0, 0, 0, 1, 1, 2], [0], [0]>} : vector<2x8x8xf32>, vector<2x8x8xf32>, vector<2x8x8xf32> -> vector<2x8x8xf32>
    "tpu.trace_stop"() : () -> ()
    %114 = vector.extract_strided_slice %52 {offsets = [0, 0, 24], sizes = [2, 8, 8], strides = [1, 1, 1]} : vector<2x8x32xf32> to vector<2x8x8xf32>
    %115 = vector.extract_strided_slice %54 {offsets = [0, 0, 24], sizes = [2, 8, 8], strides = [1, 1, 1]} : vector<2x8x32xf32> to vector<2x8x8xf32>
    %116 = vector.extract_strided_slice %56 {offsets = [0, 0, 24], sizes = [2, 8, 8], strides = [1, 1, 1]} : vector<2x8x32xf32> to vector<2x8x8xf32>
    "tpu.trace_start"() <{level = 10 : i32, message = "bqd,bkd->bqk"}> : () -> ()
    %cst_40 = arith.constant dense<0.000000e+00> : vector<2x8x8xf32>
    %117 = tpu.matmul %114, %115, %cst_40 {dimension_numbers = #tpu.dot_dimension_numbers<[2], [2], [1], [1], [0, 0, 0, 1, 1, 1], [0], [0]>} : vector<2x8x8xf32>, vector<2x8x8xf32>, vector<2x8x8xf32> -> vector<2x8x8xf32>
    "tpu.trace_stop"() : () -> ()
    %cst_41 = arith.constant 0.353553385 : f32
    %118 = vector.broadcast %cst_41 : f32 to vector<2x8x8xf32>
    %119 = arith.mulf %117, %118 : vector<2x8x8xf32>
    %120 = vector.broadcast %17 : vector<1x8x8xf32> to vector<2x8x8xf32>
    %121 = arith.addf %119, %120 : vector<2x8x8xf32>
    %cst_42 = arith.constant dense<0xFF800000> : vector<2x8xf32>
    %122 = vector.multi_reduction <maximumf>, %121, %cst_42 [2] : vector<2x8x8xf32> to vector<2x8xf32>
    %123 = vector.shape_cast %122 : vector<2x8xf32> to vector<2x8x1xf32>
    %124 = vector.broadcast %123 : vector<2x8x1xf32> to vector<2x8x8xf32>
    %125 = arith.subf %121, %124 : vector<2x8x8xf32>
    %126 = math.exp %125 : vector<2x8x8xf32>
    %cst_43 = arith.constant dense<0.000000e+00> : vector<2x8xf32>
    %127 = vector.multi_reduction <add>, %126, %cst_43 [2] : vector<2x8x8xf32> to vector<2x8xf32>
    %128 = vector.shape_cast %127 : vector<2x8xf32> to vector<2x8x1xf32>
    %129 = tpu.reciprocal %128 {approx = true} : vector<2x8x1xf32> -> vector<2x8x1xf32>
    %130 = vector.broadcast %129 : vector<2x8x1xf32> to vector<2x8x8xf32>
    %131 = arith.mulf %126, %130 : vector<2x8x8xf32>
    "tpu.trace_start"() <{level = 10 : i32, message = "bqk,bkd->bqd"}> : () -> ()
    %cst_44 = arith.constant dense<0.000000e+00> : vector<2x8x8xf32>
    %132 = tpu.matmul %131, %116, %cst_44 {dimension_numbers = #tpu.dot_dimension_numbers<[2], [1], [1], [2], [0, 0, 0, 1, 1, 2], [0], [0]>} : vector<2x8x8xf32>, vector<2x8x8xf32>, vector<2x8x8xf32> -> vector<2x8x8xf32>
    "tpu.trace_stop"() : () -> ()
    %133 = tpu.concatenate %75, %94, %113, %132 in 2 : vector<2x8x8xf32>, vector<2x8x8xf32>, vector<2x8x8xf32>, vector<2x8x8xf32> -> vector<2x8x32xf32>
    %134 = vector.shape_cast %133 : vector<2x8x32xf32> to vector<16x32xf32>
    %c0_45 = arith.constant 0 : index
    %c0_46 = arith.constant 0 : index
    %c0_47 = arith.constant 0 : index
    %135 = vector.load %arg8[%c0_45, %c0_46, %c0_47] : memref<2x32x32xf32, #tpu.memory_space<vmem>>, vector<1x32x32xf32>
    %136 = vector.shape_cast %135 : vector<1x32x32xf32> to vector<32x32xf32>
    %cst_48 = arith.constant dense<0.000000e+00> : vector<16x32xf32>
    %137 = tpu.matmul %134, %136, %cst_48 {dimension_numbers = #tpu.dot_dimension_numbers<[1], [0], [0], [1], [0, 0, 1, 1], [], []>} : vector<16x32xf32>, vector<32x32xf32>, vector<16x32xf32> -> vector<16x32xf32>
    %c0_49 = arith.constant 0 : index
    %c0_50 = arith.constant 0 : index
    %c0_51 = arith.constant 0 : index
    %138 = vector.load %arg9[%c0_49, %c0_50, %c0_51] : memref<2x1x32xf32, #tpu.memory_space<vmem>>, vector<1x1x32xf32>
    %139 = vector.shape_cast %138 : vector<1x1x32xf32> to vector<1x32xf32>
    %140 = vector.broadcast %139 : vector<1x32xf32> to vector<16x32xf32>
    %141 = arith.addf %137, %140 : vector<16x32xf32>
    %142 = arith.addf %10, %141 : vector<16x32xf32>
    %c0_52 = arith.constant 0 : index
    %c0_53 = arith.constant 0 : index
    %c0_54 = arith.constant 0 : index
    %143 = vector.load %arg10[%c0_52, %c0_53, %c0_54] : memref<2x1x32xf32, #tpu.memory_space<vmem>>, vector<1x1x32xf32>
    %144 = vector.shape_cast %143 : vector<1x1x32xf32> to vector<1x32xf32>
    %c0_55 = arith.constant 0 : index
    %c0_56 = arith.constant 0 : index
    %c0_57 = arith.constant 0 : index
    %145 = vector.load %arg11[%c0_55, %c0_56, %c0_57] : memref<2x1x32xf32, #tpu.memory_space<vmem>>, vector<1x1x32xf32>
    %146 = vector.shape_cast %145 : vector<1x1x32xf32> to vector<1x32xf32>
    %cst_58 = arith.constant dense<0.000000e+00> : vector<16xf32>
    %147 = vector.multi_reduction <add>, %142, %cst_58 [1] : vector<16x32xf32> to vector<16xf32>
    %148 = vector.shape_cast %147 : vector<16xf32> to vector<16x1xf32>
    %cst_59 = arith.constant 3.200000e+01 : f32
    %149 = vector.broadcast %cst_59 : f32 to vector<16x1xf32>
    %150 = arith.divf %148, %149 : vector<16x1xf32>
    %151 = vector.broadcast %150 : vector<16x1xf32> to vector<16x32xf32>
    %152 = arith.subf %142, %151 : vector<16x32xf32>
    %153 = arith.mulf %152, %152 : vector<16x32xf32>
    %cst_60 = arith.constant dense<0.000000e+00> : vector<16xf32>
    %154 = vector.multi_reduction <add>, %153, %cst_60 [1] : vector<16x32xf32> to vector<16xf32>
    %155 = vector.shape_cast %154 : vector<16xf32> to vector<16x1xf32>
    %cst_61 = arith.constant 3.200000e+01 : f32
    %156 = vector.broadcast %cst_61 : f32 to vector<16x1xf32>
    %157 = arith.divf %155, %156 : vector<16x1xf32>
    %158 = vector.broadcast %150 : vector<16x1xf32> to vector<16x32xf32>
    %159 = arith.subf %142, %158 : vector<16x32xf32>
    %cst_62 = arith.constant 9.99999974E-6 : f32
    %160 = vector.broadcast %cst_62 : f32 to vector<16x1xf32>
    %161 = arith.addf %157, %160 : vector<16x1xf32>
    %162 = math.rsqrt %161 : vector<16x1xf32>
    %163 = vector.broadcast %162 : vector<16x1xf32> to vector<16x32xf32>
    %164 = arith.mulf %159, %163 : vector<16x32xf32>
    %165 = vector.broadcast %144 : vector<1x32xf32> to vector<16x32xf32>
    %166 = arith.mulf %164, %165 : vector<16x32xf32>
    %167 = vector.broadcast %146 : vector<1x32xf32> to vector<16x32xf32>
    %168 = arith.addf %166, %167 : vector<16x32xf32>
    %c0_63 = arith.constant 0 : index
    %c0_64 = arith.constant 0 : index
    %c0_65 = arith.constant 0 : index
    %169 = vector.load %arg12[%c0_63, %c0_64, %c0_65] : memref<2x32x128xf32, #tpu.memory_space<vmem>>, vector<1x32x128xf32>
    %170 = vector.shape_cast %169 : vector<1x32x128xf32> to vector<32x128xf32>
    %cst_66 = arith.constant dense<0.000000e+00> : vector<16x128xf32>
    %171 = tpu.matmul %168, %170, %cst_66 {dimension_numbers = #tpu.dot_dimension_numbers<[1], [0], [0], [1], [0, 0, 1, 1], [], []>} : vector<16x32xf32>, vector<32x128xf32>, vector<16x128xf32> -> vector<16x128xf32>
    %c0_67 = arith.constant 0 : index
    %c0_68 = arith.constant 0 : index
    %c0_69 = arith.constant 0 : index
    %172 = vector.load %arg13[%c0_67, %c0_68, %c0_69] : memref<2x1x128xf32, #tpu.memory_space<vmem>>, vector<1x1x128xf32>
    %173 = vector.shape_cast %172 : vector<1x1x128xf32> to vector<1x128xf32>
    %174 = vector.broadcast %173 : vector<1x128xf32> to vector<16x128xf32>
    %175 = arith.addf %171, %174 : vector<16x128xf32>
    %cst_70 = arith.constant 5.000000e-01 : f32
    %176 = vector.broadcast %cst_70 : f32 to vector<16x128xf32>
    %177 = arith.mulf %176, %175 : vector<16x128xf32>
    %cst_71 = arith.constant 4.471500e-02 : f32
    %178 = vector.broadcast %cst_71 : f32 to vector<16x128xf32>
    %179 = arith.mulf %178, %175 : vector<16x128xf32>
    %180 = arith.mulf %179, %175 : vector<16x128xf32>
    %181 = arith.mulf %180, %175 : vector<16x128xf32>
    %182 = arith.addf %175, %181 : vector<16x128xf32>
    %cst_72 = arith.constant 0.797884583 : f32
    %183 = vector.broadcast %cst_72 : f32 to vector<16x128xf32>
    %184 = arith.mulf %183, %182 : vector<16x128xf32>
    %185 = math.tanh %184 : vector<16x128xf32>
    %cst_73 = arith.constant 1.000000e+00 : f32
    %186 = vector.broadcast %cst_73 : f32 to vector<16x128xf32>
    %187 = arith.addf %186, %185 : vector<16x128xf32>
    %188 = arith.mulf %177, %187 : vector<16x128xf32>
    %c0_74 = arith.constant 0 : index
    %c0_75 = arith.constant 0 : index
    %c0_76 = arith.constant 0 : index
    %189 = vector.load %arg14[%c0_74, %c0_75, %c0_76] : memref<2x128x32xf32, #tpu.memory_space<vmem>>, vector<1x128x32xf32>
    %190 = vector.shape_cast %189 : vector<1x128x32xf32> to vector<128x32xf32>
    %cst_77 = arith.constant dense<0.000000e+00> : vector<16x32xf32>
    %191 = tpu.matmul %188, %190, %cst_77 {dimension_numbers = #tpu.dot_dimension_numbers<[1], [0], [0], [1], [0, 0, 1, 1], [], []>} : vector<16x128xf32>, vector<128x32xf32>, vector<16x32xf32> -> vector<16x32xf32>
    %c0_78 = arith.constant 0 : index
    %c0_79 = arith.constant 0 : index
    %c0_80 = arith.constant 0 : index
    %192 = vector.load %arg15[%c0_78, %c0_79, %c0_80] : memref<2x1x32xf32, #tpu.memory_space<vmem>>, vector<1x1x32xf32>
    %193 = vector.shape_cast %192 : vector<1x1x32xf32> to vector<1x32xf32>
    %194 = vector.broadcast %193 : vector<1x32xf32> to vector<16x32xf32>
    %195 = arith.addf %191, %194 : vector<16x32xf32>
    %196 = arith.addf %142, %195 : vector<16x32xf32>
    %c1 = arith.constant 1 : index
    %c0_81 = arith.constant 0 : index
    %c0_82 = arith.constant 0 : index
    %197 = vector.load %arg4[%c1, %c0_81, %c0_82] : memref<2x1x32xf32, #tpu.memory_space<vmem>>, vector<1x1x32xf32>
    %198 = vector.shape_cast %197 : vector<1x1x32xf32> to vector<1x32xf32>
    %c1_83 = arith.constant 1 : index
    %c0_84 = arith.constant 0 : index
    %c0_85 = arith.constant 0 : index
    %199 = vector.load %arg5[%c1_83, %c0_84, %c0_85] : memref<2x1x32xf32, #tpu.memory_space<vmem>>, vector<1x1x32xf32>
    %200 = vector.shape_cast %199 : vector<1x1x32xf32> to vector<1x32xf32>
    %cst_86 = arith.constant dense<0.000000e+00> : vector<16xf32>
    %201 = vector.multi_reduction <add>, %196, %cst_86 [1] : vector<16x32xf32> to vector<16xf32>
    %202 = vector.shape_cast %201 : vector<16xf32> to vector<16x1xf32>
    %cst_87 = arith.constant 3.200000e+01 : f32
    %203 = vector.broadcast %cst_87 : f32 to vector<16x1xf32>
    %204 = arith.divf %202, %203 : vector<16x1xf32>
    %205 = vector.broadcast %204 : vector<16x1xf32> to vector<16x32xf32>
    %206 = arith.subf %196, %205 : vector<16x32xf32>
    %207 = arith.mulf %206, %206 : vector<16x32xf32>
    %cst_88 = arith.constant dense<0.000000e+00> : vector<16xf32>
    %208 = vector.multi_reduction <add>, %207, %cst_88 [1] : vector<16x32xf32> to vector<16xf32>
    %209 = vector.shape_cast %208 : vector<16xf32> to vector<16x1xf32>
    %cst_89 = arith.constant 3.200000e+01 : f32
    %210 = vector.broadcast %cst_89 : f32 to vector<16x1xf32>
    %211 = arith.divf %209, %210 : vector<16x1xf32>
    %212 = vector.broadcast %204 : vector<16x1xf32> to vector<16x32xf32>
    %213 = arith.subf %196, %212 : vector<16x32xf32>
    %cst_90 = arith.constant 9.99999974E-6 : f32
    %214 = vector.broadcast %cst_90 : f32 to vector<16x1xf32>
    %215 = arith.addf %211, %214 : vector<16x1xf32>
    %216 = math.rsqrt %215 : vector<16x1xf32>
    %217 = vector.broadcast %216 : vector<16x1xf32> to vector<16x32xf32>
    %218 = arith.mulf %213, %217 : vector<16x32xf32>
    %219 = vector.broadcast %198 : vector<1x32xf32> to vector<16x32xf32>
    %220 = arith.mulf %218, %219 : vector<16x32xf32>
    %221 = vector.broadcast %200 : vector<1x32xf32> to vector<16x32xf32>
    %222 = arith.addf %220, %221 : vector<16x32xf32>
    %c1_91 = arith.constant 1 : index
    %c0_92 = arith.constant 0 : index
    %c0_93 = arith.constant 0 : index
    %223 = vector.load %arg6[%c1_91, %c0_92, %c0_93] : memref<2x32x96xf32, #tpu.memory_space<vmem>>, vector<1x32x96xf32>
    %224 = vector.shape_cast %223 : vector<1x32x96xf32> to vector<32x96xf32>
    %cst_94 = arith.constant dense<0.000000e+00> : vector<16x96xf32>
    %225 = tpu.matmul %222, %224, %cst_94 {dimension_numbers = #tpu.dot_dimension_numbers<[1], [0], [0], [1], [0, 0, 1, 1], [], []>} : vector<16x32xf32>, vector<32x96xf32>, vector<16x96xf32> -> vector<16x96xf32>
    %c1_95 = arith.constant 1 : index
    %c0_96 = arith.constant 0 : index
    %c0_97 = arith.constant 0 : index
    %226 = vector.load %arg7[%c1_95, %c0_96, %c0_97] : memref<2x1x96xf32, #tpu.memory_space<vmem>>, vector<1x1x96xf32>
    %227 = vector.shape_cast %226 : vector<1x1x96xf32> to vector<1x96xf32>
    %228 = vector.broadcast %227 : vector<1x96xf32> to vector<16x96xf32>
    %229 = arith.addf %225, %228 : vector<16x96xf32>
    %230 = vector.extract_strided_slice %229 {offsets = [0, 0], sizes = [16, 32], strides = [1, 1]} : vector<16x96xf32> to vector<16x32xf32>
    %231 = vector.shape_cast %230 : vector<16x32xf32> to vector<2x8x32xf32>
    %232 = vector.extract_strided_slice %229 {offsets = [0, 32], sizes = [16, 32], strides = [1, 1]} : vector<16x96xf32> to vector<16x32xf32>
    %233 = vector.shape_cast %232 : vector<16x32xf32> to vector<2x8x32xf32>
    %234 = vector.extract_strided_slice %229 {offsets = [0, 64], sizes = [16, 32], strides = [1, 1]} : vector<16x96xf32> to vector<16x32xf32>
    %235 = vector.shape_cast %234 : vector<16x32xf32> to vector<2x8x32xf32>
    %236 = vector.extract_strided_slice %231 {offsets = [0, 0, 0], sizes = [2, 8, 8], strides = [1, 1, 1]} : vector<2x8x32xf32> to vector<2x8x8xf32>
    %237 = vector.extract_strided_slice %233 {offsets = [0, 0, 0], sizes = [2, 8, 8], strides = [1, 1, 1]} : vector<2x8x32xf32> to vector<2x8x8xf32>
    %238 = vector.extract_strided_slice %235 {offsets = [0, 0, 0], sizes = [2, 8, 8], strides = [1, 1, 1]} : vector<2x8x32xf32> to vector<2x8x8xf32>
    "tpu.trace_start"() <{level = 10 : i32, message = "bqd,bkd->bqk"}> : () -> ()
    %cst_98 = arith.constant dense<0.000000e+00> : vector<2x8x8xf32>
    %239 = tpu.matmul %236, %237, %cst_98 {dimension_numbers = #tpu.dot_dimension_numbers<[2], [2], [1], [1], [0, 0, 0, 1, 1, 1], [0], [0]>} : vector<2x8x8xf32>, vector<2x8x8xf32>, vector<2x8x8xf32> -> vector<2x8x8xf32>
    "tpu.trace_stop"() : () -> ()
    %cst_99 = arith.constant 0.353553385 : f32
    %240 = vector.broadcast %cst_99 : f32 to vector<2x8x8xf32>
    %241 = arith.mulf %239, %240 : vector<2x8x8xf32>
    %242 = vector.broadcast %17 : vector<1x8x8xf32> to vector<2x8x8xf32>
    %243 = arith.addf %241, %242 : vector<2x8x8xf32>
    %cst_100 = arith.constant dense<0xFF800000> : vector<2x8xf32>
    %244 = vector.multi_reduction <maximumf>, %243, %cst_100 [2] : vector<2x8x8xf32> to vector<2x8xf32>
    %245 = vector.shape_cast %244 : vector<2x8xf32> to vector<2x8x1xf32>
    %246 = vector.broadcast %245 : vector<2x8x1xf32> to vector<2x8x8xf32>
    %247 = arith.subf %243, %246 : vector<2x8x8xf32>
    %248 = math.exp %247 : vector<2x8x8xf32>
    %cst_101 = arith.constant dense<0.000000e+00> : vector<2x8xf32>
    %249 = vector.multi_reduction <add>, %248, %cst_101 [2] : vector<2x8x8xf32> to vector<2x8xf32>
    %250 = vector.shape_cast %249 : vector<2x8xf32> to vector<2x8x1xf32>
    %251 = tpu.reciprocal %250 {approx = true} : vector<2x8x1xf32> -> vector<2x8x1xf32>
    %252 = vector.broadcast %251 : vector<2x8x1xf32> to vector<2x8x8xf32>
    %253 = arith.mulf %248, %252 : vector<2x8x8xf32>
    "tpu.trace_start"() <{level = 10 : i32, message = "bqk,bkd->bqd"}> : () -> ()
    %cst_102 = arith.constant dense<0.000000e+00> : vector<2x8x8xf32>
    %254 = tpu.matmul %253, %238, %cst_102 {dimension_numbers = #tpu.dot_dimension_numbers<[2], [1], [1], [2], [0, 0, 0, 1, 1, 2], [0], [0]>} : vector<2x8x8xf32>, vector<2x8x8xf32>, vector<2x8x8xf32> -> vector<2x8x8xf32>
    "tpu.trace_stop"() : () -> ()
    %255 = vector.extract_strided_slice %231 {offsets = [0, 0, 8], sizes = [2, 8, 8], strides = [1, 1, 1]} : vector<2x8x32xf32> to vector<2x8x8xf32>
    %256 = vector.extract_strided_slice %233 {offsets = [0, 0, 8], sizes = [2, 8, 8], strides = [1, 1, 1]} : vector<2x8x32xf32> to vector<2x8x8xf32>
    %257 = vector.extract_strided_slice %235 {offsets = [0, 0, 8], sizes = [2, 8, 8], strides = [1, 1, 1]} : vector<2x8x32xf32> to vector<2x8x8xf32>
    "tpu.trace_start"() <{level = 10 : i32, message = "bqd,bkd->bqk"}> : () -> ()
    %cst_103 = arith.constant dense<0.000000e+00> : vector<2x8x8xf32>
    %258 = tpu.matmul %255, %256, %cst_103 {dimension_numbers = #tpu.dot_dimension_numbers<[2], [2], [1], [1], [0, 0, 0, 1, 1, 1], [0], [0]>} : vector<2x8x8xf32>, vector<2x8x8xf32>, vector<2x8x8xf32> -> vector<2x8x8xf32>
    "tpu.trace_stop"() : () -> ()
    %cst_104 = arith.constant 0.353553385 : f32
    %259 = vector.broadcast %cst_104 : f32 to vector<2x8x8xf32>
    %260 = arith.mulf %258, %259 : vector<2x8x8xf32>
    %261 = vector.broadcast %17 : vector<1x8x8xf32> to vector<2x8x8xf32>
    %262 = arith.addf %260, %261 : vector<2x8x8xf32>
    %cst_105 = arith.constant dense<0xFF800000> : vector<2x8xf32>
    %263 = vector.multi_reduction <maximumf>, %262, %cst_105 [2] : vector<2x8x8xf32> to vector<2x8xf32>
    %264 = vector.shape_cast %263 : vector<2x8xf32> to vector<2x8x1xf32>
    %265 = vector.broadcast %264 : vector<2x8x1xf32> to vector<2x8x8xf32>
    %266 = arith.subf %262, %265 : vector<2x8x8xf32>
    %267 = math.exp %266 : vector<2x8x8xf32>
    %cst_106 = arith.constant dense<0.000000e+00> : vector<2x8xf32>
    %268 = vector.multi_reduction <add>, %267, %cst_106 [2] : vector<2x8x8xf32> to vector<2x8xf32>
    %269 = vector.shape_cast %268 : vector<2x8xf32> to vector<2x8x1xf32>
    %270 = tpu.reciprocal %269 {approx = true} : vector<2x8x1xf32> -> vector<2x8x1xf32>
    %271 = vector.broadcast %270 : vector<2x8x1xf32> to vector<2x8x8xf32>
    %272 = arith.mulf %267, %271 : vector<2x8x8xf32>
    "tpu.trace_start"() <{level = 10 : i32, message = "bqk,bkd->bqd"}> : () -> ()
    %cst_107 = arith.constant dense<0.000000e+00> : vector<2x8x8xf32>
    %273 = tpu.matmul %272, %257, %cst_107 {dimension_numbers = #tpu.dot_dimension_numbers<[2], [1], [1], [2], [0, 0, 0, 1, 1, 2], [0], [0]>} : vector<2x8x8xf32>, vector<2x8x8xf32>, vector<2x8x8xf32> -> vector<2x8x8xf32>
    "tpu.trace_stop"() : () -> ()
    %274 = vector.extract_strided_slice %231 {offsets = [0, 0, 16], sizes = [2, 8, 8], strides = [1, 1, 1]} : vector<2x8x32xf32> to vector<2x8x8xf32>
    %275 = vector.extract_strided_slice %233 {offsets = [0, 0, 16], sizes = [2, 8, 8], strides = [1, 1, 1]} : vector<2x8x32xf32> to vector<2x8x8xf32>
    %276 = vector.extract_strided_slice %235 {offsets = [0, 0, 16], sizes = [2, 8, 8], strides = [1, 1, 1]} : vector<2x8x32xf32> to vector<2x8x8xf32>
    "tpu.trace_start"() <{level = 10 : i32, message = "bqd,bkd->bqk"}> : () -> ()
    %cst_108 = arith.constant dense<0.000000e+00> : vector<2x8x8xf32>
    %277 = tpu.matmul %274, %275, %cst_108 {dimension_numbers = #tpu.dot_dimension_numbers<[2], [2], [1], [1], [0, 0, 0, 1, 1, 1], [0], [0]>} : vector<2x8x8xf32>, vector<2x8x8xf32>, vector<2x8x8xf32> -> vector<2x8x8xf32>
    "tpu.trace_stop"() : () -> ()
    %cst_109 = arith.constant 0.353553385 : f32
    %278 = vector.broadcast %cst_109 : f32 to vector<2x8x8xf32>
    %279 = arith.mulf %277, %278 : vector<2x8x8xf32>
    %280 = vector.broadcast %17 : vector<1x8x8xf32> to vector<2x8x8xf32>
    %281 = arith.addf %279, %280 : vector<2x8x8xf32>
    %cst_110 = arith.constant dense<0xFF800000> : vector<2x8xf32>
    %282 = vector.multi_reduction <maximumf>, %281, %cst_110 [2] : vector<2x8x8xf32> to vector<2x8xf32>
    %283 = vector.shape_cast %282 : vector<2x8xf32> to vector<2x8x1xf32>
    %284 = vector.broadcast %283 : vector<2x8x1xf32> to vector<2x8x8xf32>
    %285 = arith.subf %281, %284 : vector<2x8x8xf32>
    %286 = math.exp %285 : vector<2x8x8xf32>
    %cst_111 = arith.constant dense<0.000000e+00> : vector<2x8xf32>
    %287 = vector.multi_reduction <add>, %286, %cst_111 [2] : vector<2x8x8xf32> to vector<2x8xf32>
    %288 = vector.shape_cast %287 : vector<2x8xf32> to vector<2x8x1xf32>
    %289 = tpu.reciprocal %288 {approx = true} : vector<2x8x1xf32> -> vector<2x8x1xf32>
    %290 = vector.broadcast %289 : vector<2x8x1xf32> to vector<2x8x8xf32>
    %291 = arith.mulf %286, %290 : vector<2x8x8xf32>
    "tpu.trace_start"() <{level = 10 : i32, message = "bqk,bkd->bqd"}> : () -> ()
    %cst_112 = arith.constant dense<0.000000e+00> : vector<2x8x8xf32>
    %292 = tpu.matmul %291, %276, %cst_112 {dimension_numbers = #tpu.dot_dimension_numbers<[2], [1], [1], [2], [0, 0, 0, 1, 1, 2], [0], [0]>} : vector<2x8x8xf32>, vector<2x8x8xf32>, vector<2x8x8xf32> -> vector<2x8x8xf32>
    "tpu.trace_stop"() : () -> ()
    %293 = vector.extract_strided_slice %231 {offsets = [0, 0, 24], sizes = [2, 8, 8], strides = [1, 1, 1]} : vector<2x8x32xf32> to vector<2x8x8xf32>
    %294 = vector.extract_strided_slice %233 {offsets = [0, 0, 24], sizes = [2, 8, 8], strides = [1, 1, 1]} : vector<2x8x32xf32> to vector<2x8x8xf32>
    %295 = vector.extract_strided_slice %235 {offsets = [0, 0, 24], sizes = [2, 8, 8], strides = [1, 1, 1]} : vector<2x8x32xf32> to vector<2x8x8xf32>
    "tpu.trace_start"() <{level = 10 : i32, message = "bqd,bkd->bqk"}> : () -> ()
    %cst_113 = arith.constant dense<0.000000e+00> : vector<2x8x8xf32>
    %296 = tpu.matmul %293, %294, %cst_113 {dimension_numbers = #tpu.dot_dimension_numbers<[2], [2], [1], [1], [0, 0, 0, 1, 1, 1], [0], [0]>} : vector<2x8x8xf32>, vector<2x8x8xf32>, vector<2x8x8xf32> -> vector<2x8x8xf32>
    "tpu.trace_stop"() : () -> ()
    %cst_114 = arith.constant 0.353553385 : f32
    %297 = vector.broadcast %cst_114 : f32 to vector<2x8x8xf32>
    %298 = arith.mulf %296, %297 : vector<2x8x8xf32>
    %299 = vector.broadcast %17 : vector<1x8x8xf32> to vector<2x8x8xf32>
    %300 = arith.addf %298, %299 : vector<2x8x8xf32>
    %cst_115 = arith.constant dense<0xFF800000> : vector<2x8xf32>
    %301 = vector.multi_reduction <maximumf>, %300, %cst_115 [2] : vector<2x8x8xf32> to vector<2x8xf32>
    %302 = vector.shape_cast %301 : vector<2x8xf32> to vector<2x8x1xf32>
    %303 = vector.broadcast %302 : vector<2x8x1xf32> to vector<2x8x8xf32>
    %304 = arith.subf %300, %303 : vector<2x8x8xf32>
    %305 = math.exp %304 : vector<2x8x8xf32>
    %cst_116 = arith.constant dense<0.000000e+00> : vector<2x8xf32>
    %306 = vector.multi_reduction <add>, %305, %cst_116 [2] : vector<2x8x8xf32> to vector<2x8xf32>
    %307 = vector.shape_cast %306 : vector<2x8xf32> to vector<2x8x1xf32>
    %308 = tpu.reciprocal %307 {approx = true} : vector<2x8x1xf32> -> vector<2x8x1xf32>
    %309 = vector.broadcast %308 : vector<2x8x1xf32> to vector<2x8x8xf32>
    %310 = arith.mulf %305, %309 : vector<2x8x8xf32>
    "tpu.trace_start"() <{level = 10 : i32, message = "bqk,bkd->bqd"}> : () -> ()
    %cst_117 = arith.constant dense<0.000000e+00> : vector<2x8x8xf32>
    %311 = tpu.matmul %310, %295, %cst_117 {dimension_numbers = #tpu.dot_dimension_numbers<[2], [1], [1], [2], [0, 0, 0, 1, 1, 2], [0], [0]>} : vector<2x8x8xf32>, vector<2x8x8xf32>, vector<2x8x8xf32> -> vector<2x8x8xf32>
    "tpu.trace_stop"() : () -> ()
    %312 = tpu.concatenate %254, %273, %292, %311 in 2 : vector<2x8x8xf32>, vector<2x8x8xf32>, vector<2x8x8xf32>, vector<2x8x8xf32> -> vector<2x8x32xf32>
    %313 = vector.shape_cast %312 : vector<2x8x32xf32> to vector<16x32xf32>
    %c1_118 = arith.constant 1 : index
    %c0_119 = arith.constant 0 : index
    %c0_120 = arith.constant 0 : index
    %314 = vector.load %arg8[%c1_118, %c0_119, %c0_120] : memref<2x32x32xf32, #tpu.memory_space<vmem>>, vector<1x32x32xf32>
    %315 = vector.shape_cast %314 : vector<1x32x32xf32> to vector<32x32xf32>
    %cst_121 = arith.constant dense<0.000000e+00> : vector<16x32xf32>
    %316 = tpu.matmul %313, %315, %cst_121 {dimension_numbers = #tpu.dot_dimension_numbers<[1], [0], [0], [1], [0, 0, 1, 1], [], []>} : vector<16x32xf32>, vector<32x32xf32>, vector<16x32xf32> -> vector<16x32xf32>
    %c1_122 = arith.constant 1 : index
    %c0_123 = arith.constant 0 : index
    %c0_124 = arith.constant 0 : index
    %317 = vector.load %arg9[%c1_122, %c0_123, %c0_124] : memref<2x1x32xf32, #tpu.memory_space<vmem>>, vector<1x1x32xf32>
    %318 = vector.shape_cast %317 : vector<1x1x32xf32> to vector<1x32xf32>
    %319 = vector.broadcast %318 : vector<1x32xf32> to vector<16x32xf32>
    %320 = arith.addf %316, %319 : vector<16x32xf32>
    %321 = arith.addf %196, %320 : vector<16x32xf32>
    %c1_125 = arith.constant 1 : index
    %c0_126 = arith.constant 0 : index
    %c0_127 = arith.constant 0 : index
    %322 = vector.load %arg10[%c1_125, %c0_126, %c0_127] : memref<2x1x32xf32, #tpu.memory_space<vmem>>, vector<1x1x32xf32>
    %323 = vector.shape_cast %322 : vector<1x1x32xf32> to vector<1x32xf32>
    %c1_128 = arith.constant 1 : index
    %c0_129 = arith.constant 0 : index
    %c0_130 = arith.constant 0 : index
    %324 = vector.load %arg11[%c1_128, %c0_129, %c0_130] : memref<2x1x32xf32, #tpu.memory_space<vmem>>, vector<1x1x32xf32>
    %325 = vector.shape_cast %324 : vector<1x1x32xf32> to vector<1x32xf32>
    %cst_131 = arith.constant dense<0.000000e+00> : vector<16xf32>
    %326 = vector.multi_reduction <add>, %321, %cst_131 [1] : vector<16x32xf32> to vector<16xf32>
    %327 = vector.shape_cast %326 : vector<16xf32> to vector<16x1xf32>
    %cst_132 = arith.constant 3.200000e+01 : f32
    %328 = vector.broadcast %cst_132 : f32 to vector<16x1xf32>
    %329 = arith.divf %327, %328 : vector<16x1xf32>
    %330 = vector.broadcast %329 : vector<16x1xf32> to vector<16x32xf32>
    %331 = arith.subf %321, %330 : vector<16x32xf32>
    %332 = arith.mulf %331, %331 : vector<16x32xf32>
    %cst_133 = arith.constant dense<0.000000e+00> : vector<16xf32>
    %333 = vector.multi_reduction <add>, %332, %cst_133 [1] : vector<16x32xf32> to vector<16xf32>
    %334 = vector.shape_cast %333 : vector<16xf32> to vector<16x1xf32>
    %cst_134 = arith.constant 3.200000e+01 : f32
    %335 = vector.broadcast %cst_134 : f32 to vector<16x1xf32>
    %336 = arith.divf %334, %335 : vector<16x1xf32>
    %337 = vector.broadcast %329 : vector<16x1xf32> to vector<16x32xf32>
    %338 = arith.subf %321, %337 : vector<16x32xf32>
    %cst_135 = arith.constant 9.99999974E-6 : f32
    %339 = vector.broadcast %cst_135 : f32 to vector<16x1xf32>
    %340 = arith.addf %336, %339 : vector<16x1xf32>
    %341 = math.rsqrt %340 : vector<16x1xf32>
    %342 = vector.broadcast %341 : vector<16x1xf32> to vector<16x32xf32>
    %343 = arith.mulf %338, %342 : vector<16x32xf32>
    %344 = vector.broadcast %323 : vector<1x32xf32> to vector<16x32xf32>
    %345 = arith.mulf %343, %344 : vector<16x32xf32>
    %346 = vector.broadcast %325 : vector<1x32xf32> to vector<16x32xf32>
    %347 = arith.addf %345, %346 : vector<16x32xf32>
    %c1_136 = arith.constant 1 : index
    %c0_137 = arith.constant 0 : index
    %c0_138 = arith.constant 0 : index
    %348 = vector.load %arg12[%c1_136, %c0_137, %c0_138] : memref<2x32x128xf32, #tpu.memory_space<vmem>>, vector<1x32x128xf32>
    %349 = vector.shape_cast %348 : vector<1x32x128xf32> to vector<32x128xf32>
    %cst_139 = arith.constant dense<0.000000e+00> : vector<16x128xf32>
    %350 = tpu.matmul %347, %349, %cst_139 {dimension_numbers = #tpu.dot_dimension_numbers<[1], [0], [0], [1], [0, 0, 1, 1], [], []>} : vector<16x32xf32>, vector<32x128xf32>, vector<16x128xf32> -> vector<16x128xf32>
    %c1_140 = arith.constant 1 : index
    %c0_141 = arith.constant 0 : index
    %c0_142 = arith.constant 0 : index
    %351 = vector.load %arg13[%c1_140, %c0_141, %c0_142] : memref<2x1x128xf32, #tpu.memory_space<vmem>>, vector<1x1x128xf32>
    %352 = vector.shape_cast %351 : vector<1x1x128xf32> to vector<1x128xf32>
    %353 = vector.broadcast %352 : vector<1x128xf32> to vector<16x128xf32>
    %354 = arith.addf %350, %353 : vector<16x128xf32>
    %cst_143 = arith.constant 5.000000e-01 : f32
    %355 = vector.broadcast %cst_143 : f32 to vector<16x128xf32>
    %356 = arith.mulf %355, %354 : vector<16x128xf32>
    %cst_144 = arith.constant 4.471500e-02 : f32
    %357 = vector.broadcast %cst_144 : f32 to vector<16x128xf32>
    %358 = arith.mulf %357, %354 : vector<16x128xf32>
    %359 = arith.mulf %358, %354 : vector<16x128xf32>
    %360 = arith.mulf %359, %354 : vector<16x128xf32>
    %361 = arith.addf %354, %360 : vector<16x128xf32>
    %cst_145 = arith.constant 0.797884583 : f32
    %362 = vector.broadcast %cst_145 : f32 to vector<16x128xf32>
    %363 = arith.mulf %362, %361 : vector<16x128xf32>
    %364 = math.tanh %363 : vector<16x128xf32>
    %cst_146 = arith.constant 1.000000e+00 : f32
    %365 = vector.broadcast %cst_146 : f32 to vector<16x128xf32>
    %366 = arith.addf %365, %364 : vector<16x128xf32>
    %367 = arith.mulf %356, %366 : vector<16x128xf32>
    %c1_147 = arith.constant 1 : index
    %c0_148 = arith.constant 0 : index
    %c0_149 = arith.constant 0 : index
    %368 = vector.load %arg14[%c1_147, %c0_148, %c0_149] : memref<2x128x32xf32, #tpu.memory_space<vmem>>, vector<1x128x32xf32>
    %369 = vector.shape_cast %368 : vector<1x128x32xf32> to vector<128x32xf32>
    %cst_150 = arith.constant dense<0.000000e+00> : vector<16x32xf32>
    %370 = tpu.matmul %367, %369, %cst_150 {dimension_numbers = #tpu.dot_dimension_numbers<[1], [0], [0], [1], [0, 0, 1, 1], [], []>} : vector<16x128xf32>, vector<128x32xf32>, vector<16x32xf32> -> vector<16x32xf32>
    %c1_151 = arith.constant 1 : index
    %c0_152 = arith.constant 0 : index
    %c0_153 = arith.constant 0 : index
    %371 = vector.load %arg15[%c1_151, %c0_152, %c0_153] : memref<2x1x32xf32, #tpu.memory_space<vmem>>, vector<1x1x32xf32>
    %372 = vector.shape_cast %371 : vector<1x1x32xf32> to vector<1x32xf32>
    %373 = vector.broadcast %372 : vector<1x32xf32> to vector<16x32xf32>
    %374 = arith.addf %370, %373 : vector<16x32xf32>
    %375 = arith.addf %321, %374 : vector<16x32xf32>
    %c0_154 = arith.constant 0 : index
    %c0_155 = arith.constant 0 : index
    %376 = vector.load %arg16[%c0_154, %c0_155] : memref<1x32xf32, #tpu.memory_space<vmem>>, vector<1x32xf32>
    %c0_156 = arith.constant 0 : index
    %c0_157 = arith.constant 0 : index
    %377 = vector.load %arg17[%c0_156, %c0_157] : memref<1x32xf32, #tpu.memory_space<vmem>>, vector<1x32xf32>
    %cst_158 = arith.constant dense<0.000000e+00> : vector<16xf32>
    %378 = vector.multi_reduction <add>, %375, %cst_158 [1] : vector<16x32xf32> to vector<16xf32>
    %379 = vector.shape_cast %378 : vector<16xf32> to vector<16x1xf32>
    %cst_159 = arith.constant 3.200000e+01 : f32
    %380 = vector.broadcast %cst_159 : f32 to vector<16x1xf32>
    %381 = arith.divf %379, %380 : vector<16x1xf32>
    %382 = vector.broadcast %381 : vector<16x1xf32> to vector<16x32xf32>
    %383 = arith.subf %375, %382 : vector<16x32xf32>
    %384 = arith.mulf %383, %383 : vector<16x32xf32>
    %cst_160 = arith.constant dense<0.000000e+00> : vector<16xf32>
    %385 = vector.multi_reduction <add>, %384, %cst_160 [1] : vector<16x32xf32> to vector<16xf32>
    %386 = vector.shape_cast %385 : vector<16xf32> to vector<16x1xf32>
    %cst_161 = arith.constant 3.200000e+01 : f32
    %387 = vector.broadcast %cst_161 : f32 to vector<16x1xf32>
    %388 = arith.divf %386, %387 : vector<16x1xf32>
    %389 = vector.broadcast %381 : vector<16x1xf32> to vector<16x32xf32>
    %390 = arith.subf %375, %389 : vector<16x32xf32>
    %cst_162 = arith.constant 9.99999974E-6 : f32
    %391 = vector.broadcast %cst_162 : f32 to vector<16x1xf32>
    %392 = arith.addf %388, %391 : vector<16x1xf32>
    %393 = math.rsqrt %392 : vector<16x1xf32>
    %394 = vector.broadcast %393 : vector<16x1xf32> to vector<16x32xf32>
    %395 = arith.mulf %390, %394 : vector<16x32xf32>
    %396 = vector.broadcast %376 : vector<1x32xf32> to vector<16x32xf32>
    %397 = arith.mulf %395, %396 : vector<16x32xf32>
    %398 = vector.broadcast %377 : vector<1x32xf32> to vector<16x32xf32>
    %399 = arith.addf %397, %398 : vector<16x32xf32>
    %cst_163 = arith.constant dense<0.000000e+00> : vector<16x64xf32>
    %400 = tpu.matmul %399, %0, %cst_163 {dimension_numbers = #tpu.dot_dimension_numbers<[1], [1], [0], [0], [0, 0, 1, 0], [], []>} : vector<16x32xf32>, vector<64x32xf32>, vector<16x64xf32> -> vector<16x64xf32>
    %c0_164 = arith.constant 0 : index
    %c0_165 = arith.constant 0 : index
    %401 = vector.load %arg18[%c0_164, %c0_165] : memref<16x64xf32, #tpu.memory_space<vmem>>, vector<16x64xf32>
    tpu.vector_store %arg18[%c0_164, %c0_165], %400 {strides = array<i32>} : memref<16x64xf32, #tpu.memory_space<vmem>>, vector<16x64xf32>,
    return
  }
  func.func @transform_0(%arg0: i32) -> (i32, i32) {
    %c0_i32 = arith.constant 0 : i32
    %c0_i32_0 = arith.constant 0 : i32
    %c0_i32_1 = arith.constant 0 : i32
    return %c0_i32, %c0_i32_0 : i32, i32
  }
  func.func @transform_1(%arg0: i32) -> (i32, i32) {
    %c0_i32 = arith.constant 0 : i32
    %c0_i32_0 = arith.constant 0 : i32
    %c0_i32_1 = arith.constant 0 : i32
    return %c0_i32, %c0_i32_0 : i32, i32
  }
  func.func @transform_2(%arg0: i32) -> (i32, i32) {
    %c0_i32 = arith.constant 0 : i32
    %c0_i32_0 = arith.constant 0 : i32
    %c0_i32_1 = arith.constant 0 : i32
    return %c0_i32, %c0_i32_0 : i32, i32
  }
  func.func @transform_3(%arg0: i32) -> (i32, i32, i32) {
    %c0_i32 = arith.constant 0 : i32
    %c0_i32_0 = arith.constant 0 : i32
    %c0_i32_1 = arith.constant 0 : i32
    %c0_i32_2 = arith.constant 0 : i32
    return %c0_i32, %c0_i32_0, %c0_i32_1 : i32, i32, i32
  }
  func.func @transform_4(%arg0: i32) -> (i32, i32, i32) {
    %c0_i32 = arith.constant 0 : i32
    %c0_i32_0 = arith.constant 0 : i32
    %c0_i32_1 = arith.constant 0 : i32
    %c0_i32_2 = arith.constant 0 : i32
    return %c0_i32, %c0_i32_0, %c0_i32_1 : i32, i32, i32
  }
  func.func @transform_5(%arg0: i32) -> (i32, i32, i32) {
    %c0_i32 = arith.constant 0 : i32
    %c0_i32_0 = arith.constant 0 : i32
    %c0_i32_1 = arith.constant 0 : i32
    %c0_i32_2 = arith.constant 0 : i32
    return %c0_i32, %c0_i32_0, %c0_i32_1 : i32, i32, i32
  }
  func.func @transform_6(%arg0: i32) -> (i32, i32, i32) {
    %c0_i32 = arith.constant 0 : i32
    %c0_i32_0 = arith.constant 0 : i32
    %c0_i32_1 = arith.constant 0 : i32
    %c0_i32_2 = arith.constant 0 : i32
    return %c0_i32, %c0_i32_0, %c0_i32_1 : i32, i32, i32
  }
  func.func @transform_7(%arg0: i32) -> (i32, i32, i32) {
    %c0_i32 = arith.constant 0 : i32
    %c0_i32_0 = arith.constant 0 : i32
    %c0_i32_1 = arith.constant 0 : i32
    %c0_i32_2 = arith.constant 0 : i32
    return %c0_i32, %c0_i32_0, %c0_i32_1 : i32, i32, i32
  }
  func.func @transform_8(%arg0: i32) -> (i32, i32, i32) {
    %c0_i32 = arith.constant 0 : i32
    %c0_i32_0 = arith.constant 0 : i32
    %c0_i32_1 = arith.constant 0 : i32
    %c0_i32_2 = arith.constant 0 : i32
    return %c0_i32, %c0_i32_0, %c0_i32_1 : i32, i32, i32
  }
  func.func @transform_9(%arg0: i32) -> (i32, i32, i32) {
    %c0_i32 = arith.constant 0 : i32
    %c0_i32_0 = arith.constant 0 : i32
    %c0_i32_1 = arith.constant 0 : i32
    %c0_i32_2 = arith.constant 0 : i32
    return %c0_i32, %c0_i32_0, %c0_i32_1 : i32, i32, i32
  }
  func.func @transform_10(%arg0: i32) -> (i32, i32, i32) {
    %c0_i32 = arith.constant 0 : i32
    %c0_i32_0 = arith.constant 0 : i32
    %c0_i32_1 = arith.constant 0 : i32
    %c0_i32_2 = arith.constant 0 : i32
    return %c0_i32, %c0_i32_0, %c0_i32_1 : i32, i32, i32
  }
  func.func @transform_11(%arg0: i32) -> (i32, i32, i32) {
    %c0_i32 = arith.constant 0 : i32
    %c0_i32_0 = arith.constant 0 : i32
    %c0_i32_1 = arith.constant 0 : i32
    %c0_i32_2 = arith.constant 0 : i32
    return %c0_i32, %c0_i32_0, %c0_i32_1 : i32, i32, i32
  }
  func.func @transform_12(%arg0: i32) -> (i32, i32, i32) {
    %c0_i32 = arith.constant 0 : i32
    %c0_i32_0 = arith.constant 0 : i32
    %c0_i32_1 = arith.constant 0 : i32
    %c0_i32_2 = arith.constant 0 : i32
    return %c0_i32, %c0_i32_0, %c0_i32_1 : i32, i32, i32
  }
  func.func @transform_13(%arg0: i32) -> (i32, i32, i32) {
    %c0_i32 = arith.constant 0 : i32
    %c0_i32_0 = arith.constant 0 : i32
    %c0_i32_1 = arith.constant 0 : i32
    %c0_i32_2 = arith.constant 0 : i32
    return %c0_i32, %c0_i32_0, %c0_i32_1 : i32, i32, i32
  }
  func.func @transform_14(%arg0: i32) -> (i32, i32, i32) {
    %c0_i32 = arith.constant 0 : i32
    %c0_i32_0 = arith.constant 0 : i32
    %c0_i32_1 = arith.constant 0 : i32
    %c0_i32_2 = arith.constant 0 : i32
    return %c0_i32, %c0_i32_0, %c0_i32_1 : i32, i32, i32
  }
  func.func @transform_15(%arg0: i32) -> (i32, i32) {
    %c0_i32 = arith.constant 0 : i32
    %c0_i32_0 = arith.constant 0 : i32
    %c0_i32_1 = arith.constant 0 : i32
    return %c0_i32, %c0_i32_0 : i32, i32
  }
  func.func @transform_16(%arg0: i32) -> (i32, i32) {
    %c0_i32 = arith.constant 0 : i32
    %c0_i32_0 = arith.constant 0 : i32
    %c0_i32_1 = arith.constant 0 : i32
    return %c0_i32, %c0_i32_0 : i32, i32
  }
  func.func @transform_17(%arg0: i32) -> (i32, i32) {
    %c0_i32 = arith.constant 0 : i32
    %c0_i32_0 = arith.constant 0 : i32
    %c0_i32_1 = arith.constant 0 : i32
    return %c0_i32, %c0_i32_0 : i32, i32
  }
}

</mosaic_0001>

<bundles_post_ra>
// kernel: gpt_module_forward.1
= control target key start
LH: loop header
LB: loop body
LE: loop exit
PB: predicated region body
PF: predicated region fallthrough
CT: control target
= control target key end

     0   :  { %s5788_s0 = inlined_call_operand.vmem [shape: s32[16,1], index: 0, kind: input, shape index: {}]   ;;  %s5789_s1 = inlined_call_operand.vmem [shape: f32[64,32], index: 1, kind: input, shape index: {}]   ;;  %s5790_s2 = inlined_call_operand.vmem [shape: f32[8,32], index: 2, kind: input, shape index: {}]   ;;  %s5791_s3 = inlined_call_operand.vmem [shape: f32[2,1,32], index: 3, kind: input, shape index: {}]   ;;  %s5792_s4 = inlined_call_operand.vmem [shape: f32[2,1,32], index: 4, kind: input, shape index: {}]   ;;  %s5793_s5 = inlined_call_operand.vmem [shape: f32[2,32,96], index: 5, kind: input, shape index: {}]   ;;  %s5794_s6 = inlined_call_operand.vmem [shape: f32[2,1,96], index: 6, kind: input, shape index: {}]   ;;  %s5795_s7 = inlined_call_operand.vmem [shape: f32[2,32,32], index: 7, kind: input, shape index: {}]   ;;  %s5796_s8 = inlined_call_operand.vmem [shape: f32[2,1,32], index: 8, kind: input, shape index: {}]   ;;  %s5797_s9 = inlined_call_operand.vmem [shape: f32[2,1,32], index: 9, kind: input, shape index: {}]   ;;  %s5798_s10 = inlined_call_operand.vmem [shape: f32[2,1,32], index: 10, kind: input, shape index: {}]   ;;  %s5799_s11 = inlined_call_operand.vmem [shape: f32[2,32,128], index: 11, kind: input, shape index: {}]   ;;  %s5800_s12 = inlined_call_operand.vmem [shape: f32[2,1,128], index: 12, kind: input, shape index: {}]   ;;  %s5801_s13 = inlined_call_operand.vmem [shape: f32[2,128,32], index: 13, kind: input, shape index: {}]   ;;  %s5802_s14 = inlined_call_operand.vmem [shape: f32[2,1,32], index: 14, kind: input, shape index: {}]   ;;  %s5803_s15 = inlined_call_operand.vmem [shape: f32[1,32], index: 15, kind: input, shape index: {}]   ;;  %s5804_s16 = inlined_call_operand.vmem [shape: f32[1,32], index: 16, kind: input, shape index: {}]   ;;  %s5805_s17 = inlined_call_operand.hbm [shape: f32[16,64], index: 17, kind: output, shape index: {}]  }
   0x1   :  { %5823 = sst [smem:[#allocation5_spill]] %s5788_s0 }
   0x2   :  { %5824 = sst [smem:[#allocation6_spill]] %s5789_s1 }
   0x3   :  { %5825 = sst [smem:[#allocation7_spill]] %s5800_s12 }
   0x4   :  { %s5826_s26 = sld [smem:[#allocation5_spill]]  ;;  %s5827_s12 = sld [smem:[#allocation6_spill]]  ;;  %v4955_v2 = vmov 0  }
   0x5   :  { %4838 = vset.pattern.permute.xlu0 %v4955_v2 }
   0xa   :  { %v65_v0 = vld [vmem:[%s5826_s26] sm:$0xff]  ;;  %v58_v3 = vld [vmem:[%s5827_s12 + $0x8] sm:$0xff]  ;;  %v59_v4 = vld [vmem:[%s5827_s12 + $0x10] sm:$0xff] }
   0xb   :  { %v57_v1 = vld [vmem:[%s5827_s12] sm:$0xff]  ;;  %v60_v5 = vld [vmem:[%s5827_s12 + $0x18] sm:$0xff]  ;;  %70 = vperm.xlu0 %4838, %v65_v0   ;;  %v66_v6 = vld [vmem:[%s5826_s26 + $0x8] sm:$0xff] }
   0xc   :  { %v5083_v7 = vpack.c.bf16 %v58_v3, %v57_v1  ;;  %v5085_v8 = vpack.c.bf16 %v60_v5, %v59_v4  ;;  %v61_v9 = vld [vmem:[%s5827_s12 + $0x20] sm:$0xff]  ;;  %v62_v10 = vld [vmem:[%s5827_s12 + $0x28] sm:$0xff] }
   0xd   :  { %22 = vsyncpa [#allocation3], 0  ;;  %v5096_v11 = vpack.c.bf16 %v62_v10, %v61_v9  ;;  %v63_v12 = vld [vmem:[%s5827_s12 + $0x30] sm:$0xff]  ;;  %v64_v13 = vld [vmem:[%s5827_s12 + $0x38] sm:$0xff]  ;;  %v4956_v15 = vmov 0.0   ;;  %v67_v16 = vlaneseq  ;;  %vm82_vm0 = vcmask 523264  }
   0xe   :  { %4667 = vmatprep.subr.bf16.mxu0 %v5083_v7  ;;  %v5106_v14 = vpack.c.bf16 %v64_v13, %v63_v12  ;;  %v81_v22 = vld [vmem:[%s5790_s2] sm:$0xff]  ;;  %vm170_vm3 = vcmask 261120   ;;  %v215_v40 = vld [vmem:[%s5793_s5 + $0x8] sm:$0xff]  ;;  %v216_v41 = vld [vmem:[%s5793_s5 + $0x10] sm:$0xff]  ;;  %vm4957_vm4 = vmmov 0   ;;  %s4958_s29 = smov 96  }
   0xf   :  { %4669 = vmatpush3.bf16.msra.mxu0 %v5083_v7  ;;  %73 = vperm.xlu0 %4838, %v66_v6   ;;  %v5113_v17 = vand.u32 127, %v67_v16  ;;  %v214_v39 = vld [vmem:[%s5793_s5] sm:$0xff]  ;;  %v217_v43 = vld [vmem:[%s5793_s5 + $0x18] sm:$0xff]  ;;  %vm309_vm5 = vcmask 64512   ;;  %v165_v4 = vshrl.u32 %v67_v16, 7  ;;  %s4960_s12 = smov 64   ;;  %vm4795_vm9 = vmpackc.low %vm170_vm3, %vm170_vm3 }
  0x10   :  { %4671 = vmatprep.subr.bf16.mxu0 %v5085_v8  ;;  %v4682_v42 = vpack.c.bf16 %v215_v40, %v214_v39  ;;  %v4686_v44 = vpack.c.bf16 %v217_v43, %v216_v41  ;;  %v4052_v52 = vld [vmem:[%s5791_s3] ss:$0 sm:$0xff]  ;;  %v4959_v5 = vmov -1e+09   ;;  %s4961_s0 = smov 88   ;;  %s4962_s2 = smov 120  }
  0x11   :  { %v4053_v54 = vld [vmem:[%s5792_s4] ss:$0 sm:$0xff]  ;;  %vm166_vm6 = vcmp.le.s32.totalorder %v5113_v17, %v165_v4  ;;  %s4963_s30 = smov 56   ;;  %s4964_s18 = smov 80   ;;  %vm1670_vm7 = vcmask 195584   ;;  %vm1667_vm8 = vcmask 130048  }
  0x12   :  { %4683 = vmatprep.subr.bf16.mxu1 %v4682_v42  ;;  %v4054_v61 = vld [vmem:[%s5794_s6] ss:$0 sm:$0xff]  ;;  %v5186_v6 = vsel %vm166_vm6, 0.0, %v4959_v5  ;;  %s4965_s19 = smov 112   ;;  %s5821_s1 = smov 48  }
  0x13   :  { %4673 = vmatpush3.bf16.msra.mxu0 %v5085_v8  ;;  %4685 = vmatpush3.bf16.msra.mxu1 %v4682_v42  ;;  %s5819_s20 = smov 72   ;;  %s5815_s21 = smov 104  }
  0x14   :  { %4675 = vmatprep.subr.bf16.mxu0 %v5096_v11  ;;  %4687 = vmatprep.subr.bf16.mxu1 %v4686_v44  ;;  %s5813_s22 = smov 40   ;;  %s5811_s23 = smov 8  }
  0x15   :  { %s5809_s24 = smov 16   ;;  %s5817_s25 = smov 24  }
  0x16   :  { %s5828_s26 = sld [smem:[#allocation7_spill]] }
  0x17   :  { %4677 = vmatpush3.bf16.msra.mxu0 %v5096_v11  ;;  %4689 = vmatpush3.bf16.msra.mxu1 %v4686_v44 }
  0x18   :  { %4679 = vmatprep.subr.bf16.mxu0 %v5106_v14  ;;  %4362 = vmatprep.subr.mxu1 %v4956_v15 }
  0x1b   :  { %4681 = vmatpush3.bf16.msra.mxu0 %v5106_v14 }
  0x1c   :  { %4372 = vmatprep.subr.mxu0 %v4956_v15 }
  0x8a   :  { %v71_v18 = vpop.permute.xlu0 %70 }
  0x8b   :  { %vm75_vm1 = vcmp.eq.s32.totalorder %v5113_v17, %v71_v18 }
  0x8c   :  { %v4048_v19 = vsel %vm75_vm1, 1.0, %v4956_v15 }
  0x8d   :  { %4348 = vmatprep.mubr.msk.f32.mxu0 %vm82_vm0, %v4048_v19 }
  0x8e   :  { %v74_v20 = vpop.permute.xlu0 %73 }
  0x8f   :  { %vm76_vm2 = vcmp.eq.s32.totalorder %v5113_v17, %v74_v20 }
  0x90   :  { %v4049_v21 = vsel %vm76_vm2, 1.0, %v4956_v15 }
  0x91   :  { %4349 = vmatmul.mubr.msk.f32.vlgmr.msra.gmra.mrb[0].mxu0 %vm82_vm0, %v4049_v21 }
  0x92   :  { %4374 = vmatprep.mubr.msk.f32.mxu0 %vm4957_vm4, %v4956_v15 }
 0x164   :  { %v4350_v23 = vpop.f32.mrb[0].mxu0 }
 0x165   :  { %v155_v24 = vpop.f32.mrb[1].mxu0  ;;  %v5126_v26 = vadd.f32 %v4350_v23, %v81_v22 }
 0x166   :  { %v5124_v25 = vadd.f32 %v155_v24, %v81_v22 }
 0x167   :  { %v174_v28 = vsel %vm170_vm3, %v5126_v26, 0.0 }
 0x168   :  { %v171_v27 = vsel %vm170_vm3, %v5124_v25, 0.0 }
 0x169   :  { %172 = vadd.xlane.f32.xlu1 %v171_v27 }
 0x16d   :  { %175 = vadd.xlane.f32.xlu1 %v174_v28 }
 0x1f6   :  { %v173_v29 = vpop.xlane.xlu1 %172 }
 0x1f7   :  { %v178_v30 = vmul.f32 0.03125, %v173_v29 }
 0x1f9   :  { %v180_v31 = vsub.f32 %v5124_v25, %v178_v30 }
 0x1fa   :  { %v176_v32 = vpop.xlane.xlu1 %175 }
 0x1fb   :  { %v179_v33 = vmul.f32 0.03125, %v176_v32  ;;  %v182_v34 = vmul.f32 %v180_v31, %v180_v31 }
 0x1fd   :  { %v181_v35 = vsub.f32 %v5126_v26, %v179_v33  ;;  %v184_v36 = vsel %vm170_vm3, %v182_v34, 0.0 }
 0x1fe   :  { %185 = vadd.xlane.f32.xlu0 %v184_v36 }
 0x1ff   :  { %v183_v37 = vmul.f32 %v181_v35, %v181_v35 }
 0x201   :  { %v187_v38 = vsel %vm170_vm3, %v183_v37, 0.0 }
 0x202   :  { %188 = vadd.xlane.f32.xlu1 %v187_v38 }
 0x28b   :  { %v186_v45 = vpop.xlane.xlu0 %185 }
 0x28c   :  { %v190_v46 = vmul.f32 0.03125, %v186_v45 }
 0x28e   :  { %v192_v47 = vadd.f32 1e-05, %v190_v46 }
 0x28f   :  { %v189_v48 = vpop.xlane.xlu1 %188 }
 0x290   :  { %4839 = vrsqrt.f32 %v192_v47  ;;  %v191_v49 = vmul.f32 0.03125, %v189_v48 }
 0x292   :  { %v193_v50 = vadd.f32 1e-05, %v191_v49 }
 0x294   :  { %4841 = vrsqrt.f32 %v193_v50 }
 0x29a   :  { %v4840_v51 = vpop.eup %4839 }
 0x29b   :  { %v196_v53 = vmul.f32 %v4840_v51, %v180_v31 }
 0x29d   :  { %v204_v55 = vmul.f32 %v4052_v52, %v196_v53 }
 0x29e   :  { %v4842_v56 = vpop.eup %4841 }
 0x29f   :  { %v197_v57 = vmul.f32 %v4842_v56, %v181_v35  ;;  %v212_v58 = vadd.f32 %v4053_v54, %v204_v55 }
 0x2a1   :  { %v205_v59 = vmul.f32 %v4052_v52, %v197_v57  ;;  %4359 = vmatprep.mubr.msk.f32.mxu1 %vm170_vm3, %v212_v58 }
 0x2a3   :  { %v213_v60 = vadd.f32 %v4053_v54, %v205_v59 }
 0x2a5   :  { %4360 = vmatmul.mubr.msk.f32.vlgmr.msra.gmra.mrb[0].mxu1 %vm170_vm3, %v213_v60 }
 0x2a6   :  { %4364 = vmatprep.mubr.msk.f32.mxu1 %vm4957_vm4, %v4956_v15 }
 0x378   :  { %v4361_v62 = vpop.f32.mrb[0].mxu1 }
 0x379   :  { %v297_v63 = vpop.f32.mrb[1].mxu1  ;;  %v5168_v1 = vadd.f32 %v4361_v62, %v4054_v61 }
 0x37a   :  { %v5164_v0 = vadd.f32 %v4054_v61, %v297_v63 }
 0x37c   :  { %307 = vrot.lane.b32.xlu1 %v5164_v0, %s4958_s29 }
 0x380   :  { %385 = vrot.lane.b32.xlu1 %v5168_v1, %s4958_s29 }
 0x3ee   :  { %v308_v2 = vpop.permute.xlu1 %307 }
 0x3ef   :  { %4363 = vmatpush3.xpose.msk.msra.mxu1 %vm309_vm5, %v308_v2 }
 0x3f0   :  { %4367 = vmatprep.subr.mxu1 %v4956_v15 }
 0x3f2   :  { %4365 = vmatmul.mubr.msk.f32.vlgmr.msra.gmra.mrb[2].mxu1 %vm309_vm5, %v5164_v0  ;;  %v386_v3 = vpop.permute.xlu1 %385 }
 0x3f3   :  { %4368 = vmatpush3.xpose.msk.msra.mxu1 %vm309_vm5, %v386_v3  ;;  %4369 = vmatprep.mubr.msk.f32.mxu1 %vm4957_vm4, %v4956_v15 }
 0x3f4   :  { %4377 = vmatprep.subr.mxu1 %v4956_v15 }
 0x3f6   :  { %4370 = vmatmul.mubr.msk.f32.vlgmr.msra.gmra.mrb[4].mxu1 %vm309_vm5, %v5168_v1 }
 0x3f7   :  { %4379 = vmatprep.mubr.msk.f32.mxu1 %vm4957_vm4, %v4956_v15 }
 0x4c5   :  { %v380_v9 = vpop.f32.mrb[2].mxu1 }
 0x4c6   :  { %v461_v10 = vmul.f32 0.35355338, %v380_v9  ;;  %v4366_v12 = vpop.f32.mrb[3].mxu1 }
 0x4c8   :  { %v463_v13 = vadd.f32 %v461_v10, %v5186_v6 }
 0x4c9   :  { %v457_v18 = vpop.f32.mrb[4].mxu1 }
 0x4ca   :  { %v462_v19 = vmul.f32 0.35355338, %v457_v18  ;;  %v4371_v20 = vpop.f32.mrb[5].mxu1  ;;  %v465_v21 = vsel %vm309_vm5, %v463_v13, -inf }
 0x4cb   :  { %466 = vmax.xlane.f32.xlu1 %v465_v21 }
 0x4cc   :  { %v464_v22 = vadd.f32 %v462_v19, %v5186_v6 }
 0x4ce   :  { %v468_v16 = vsel %vm309_vm5, %v464_v22, -inf }
 0x4cf   :  { %469 = vmax.xlane.f32.xlu0 %v468_v16 }
 0x4dc   :  { %563 = vrot.lane.b32.xlu1 %v5168_v1, %s4960_s12 }
 0x4e5   :  { %487 = vrot.lane.b32.xlu0 %v5164_v0, %s4960_s12 }
 0x4e9   :  { %641 = vrot.lane.b32.xlu0 %v5164_v0, %s4961_s0 }
 0x4ed   :  { %719 = vrot.lane.b32.xlu0 %v5168_v1, %s4961_s0 }
 0x4f1   :  { %639 = vrot.lane.b32.xlu0 %v5164_v0, %s4962_s2 }
 0x558   :  { %v467_v17 = vpop.xlane.xlu1 %466 }
 0x559   :  { %v471_v23 = vsub.f32 %v463_v13, %v467_v17 }
 0x55b   :  { %v473_v24 = vmul.f32 1.442695, %v471_v23 }
 0x55c   :  { %v470_v27 = vpop.xlane.xlu0 %469  ;;  %v564_v28 = vpop.permute.xlu1 %563 }
 0x55d   :  { %4843 = vpow2.f32 %v473_v24  ;;  %v472_v29 = vsub.f32 %v464_v22, %v470_v27  ;;  %4378 = vmatpush3.msra.mxu1 %v564_v28 }
 0x55e   :  { %4387 = vmatprep.subr.mxu1 %v4956_v15 }
 0x55f   :  { %v475_v30 = vmul.f32 1.442695, %v472_v29 }
 0x560   :  { %v488_v31 = vpop.permute.xlu0 %487 }
 0x561   :  { %4845 = vpow2.f32 %v475_v30  ;;  %4373 = vmatpush3.msra.mxu0 %v488_v31 }
 0x562   :  { %4382 = vmatprep.subr.mxu0 %v4956_v15 }
 0x564   :  { %v642_v36 = vpop.permute.xlu0 %641 }
 0x567   :  { %v4844_v32 = vpop.eup %4843 }
 0x568   :  { %v477_v33 = vsel %vm309_vm5, %v4844_v32, 0.0  ;;  %v720_v37 = vpop.permute.xlu0 %719 }
 0x569   :  { %478 = vadd.xlane.f32.xlu0 %v477_v33 }
 0x56b   :  { %v4846_v34 = vpop.eup %4845 }
 0x56c   :  { %v480_v35 = vsel %vm309_vm5, %v4846_v34, 0.0  ;;  %v640_v38 = vpop.permute.xlu0 %639 }
 0x56d   :  { %481 = vadd.xlane.f32.xlu0 %v480_v35 }
 0x583   :  { %717 = vrot.lane.b32.xlu0 %v5168_v1, %s4962_s2 }
 0x5f6   :  { %v479_v39 = vpop.xlane.xlu0 %478 }
 0x5f7   :  { %4847 = vrcp.f32 %v479_v39 }
 0x5fa   :  { %v482_v40 = vpop.xlane.xlu0 %481 }
 0x5fb   :  { %4849 = vrcp.f32 %v482_v40 }
 0x5fe   :  { %v718_v45 = vpop.permute.xlu0 %717 }
 0x601   :  { %v4848_v41 = vpop.eup %4847 }
 0x602   :  { %v485_v42 = vmul.f32 %v4848_v41, %v4844_v32 }
 0x604   :  { %4375 = vmatmul.mubr.msk.f32.vlgmr.msra.gmra.mrb[2].mxu0 %vm309_vm5, %v485_v42 }
 0x605   :  { %v4850_v43 = vpop.eup %4849  ;;  %4383 = vmatpush3.xpose.msk.msra.mxu0 %vm309_vm5, %v642_v36  ;;  %4384 = vmatprep.mubr.msk.f32.mxu0 %vm4957_vm4, %v4956_v15 }
 0x606   :  { %v486_v44 = vmul.f32 %v4850_v43, %v4846_v34  ;;  %4392 = vmatprep.subr.mxu0 %v4956_v15 }
 0x608   :  { %4380 = vmatmul.mubr.msk.f32.vlgmr.msra.gmra.mrb[6].mxu1 %vm309_vm5, %v486_v44  ;;  %4385 = vmatmul.mubr.msk.f32.vlgmr.msra.gmra.mrb[4].mxu0 %vm309_vm5, %v640_v38 }
 0x609   :  { %4388 = vmatpush3.xpose.msk.msra.mxu1 %vm309_vm5, %v720_v37  ;;  %4389 = vmatprep.mubr.msk.f32.mxu1 %vm4957_vm4, %v4956_v15 }
 0x60a   :  { %4397 = vmatprep.subr.mxu1 %v4956_v15  ;;  %4394 = vmatprep.mubr.msk.f32.mxu0 %vm4957_vm4, %v4956_v15 }
 0x60c   :  { %4390 = vmatmul.mubr.msk.f32.vlgmr.msra.gmra.mrb[8].mxu1 %vm309_vm5, %v718_v45 }
 0x60d   :  { %4399 = vmatprep.mubr.msk.f32.mxu1 %vm4957_vm4, %v4956_v15 }
 0x6d7   :  { %v5224_v46 = vpop.f32.mrb[2].mxu0 }
 0x6d8   :  { %v4376_v47 = vpop.f32.mrb[3].mxu0 }
 0x6db   :  { %v5226_v48 = vpop.f32.mrb[6].mxu1  ;;  %v713_v49 = vpop.f32.mrb[4].mxu0 }
 0x6dc   :  { %v795_v50 = vmul.f32 0.35355338, %v713_v49  ;;  %v4381_v51 = vpop.f32.mrb[7].mxu1  ;;  %v4386_v52 = vpop.f32.mrb[5].mxu0 }
 0x6de   :  { %v797_v53 = vadd.f32 %v795_v50, %v5186_v6 }
 0x6df   :  { %v791_v54 = vpop.f32.mrb[8].mxu1 }
 0x6e0   :  { %v796_v55 = vmul.f32 0.35355338, %v791_v54  ;;  %v4391_v56 = vpop.f32.mrb[9].mxu1  ;;  %v799_v57 = vsel %vm309_vm5, %v797_v53, -inf }
 0x6e1   :  { %800 = vmax.xlane.f32.xlu1 %v799_v57 }
 0x6e2   :  { %v798_v58 = vadd.f32 %v796_v55, %v5186_v6 }
 0x6e4   :  { %v802_v59 = vsel %vm309_vm5, %v798_v58, -inf }
 0x6e5   :  { %803 = vmax.xlane.f32.xlu0 %v802_v59 }
 0x6f2   :  { %897 = vrot.lane.b32.xlu1 %v5168_v1, %s4963_s30 }
 0x6f6   :  { %975 = vrot.lane.b32.xlu1 %v5164_v0, %s4964_s18 }
 0x6fb   :  { %821 = vrot.lane.b32.xlu0 %v5164_v0, %s4963_s30 }
 0x76e   :  { %v801_v60 = vpop.xlane.xlu1 %800 }
 0x76f   :  { %v805_v61 = vsub.f32 %v797_v53, %v801_v60 }
 0x771   :  { %v807_v62 = vmul.f32 1.442695, %v805_v61 }
 0x772   :  { %v804_v63 = vpop.xlane.xlu0 %803  ;;  %v898_v2 = vpop.permute.xlu1 %897 }
 0x773   :  { %4851 = vpow2.f32 %v807_v62  ;;  %v806_v3 = vsub.f32 %v798_v58, %v804_v63  ;;  %4398 = vmatpush3.msra.mxu1 %v898_v2 }
 0x774   :  { %4407 = vmatprep.subr.mxu1 %v4956_v15 }
 0x775   :  { %v809_v4 = vmul.f32 1.442695, %v806_v3 }
 0x776   :  { %v822_v5 = vpop.permute.xlu0 %821  ;;  %v976_v18 = vpop.permute.xlu1 %975 }
 0x777   :  { %4853 = vpow2.f32 %v809_v4  ;;  %4393 = vmatpush3.msra.mxu0 %v822_v5 }
 0x778   :  { %4402 = vmatprep.subr.mxu0 %v4956_v15 }
 0x77d   :  { %v4852_v9 = vpop.eup %4851 }
 0x77e   :  { %v811_v10 = vsel %vm309_vm5, %v4852_v9, 0.0 }
 0x77f   :  { %812 = vadd.xlane.f32.xlu0 %v811_v10 }
 0x781   :  { %v4854_v12 = vpop.eup %4853 }
 0x782   :  { %v814_v13 = vsel %vm309_vm5, %v4854_v12, 0.0 }
 0x783   :  { %815 = vadd.xlane.f32.xlu1 %v814_v13 }
 0x794   :  { %973 = vrot.lane.b32.xlu1 %v5164_v0, %s4965_s19 }
 0x795   :  { %1053 = vrot.lane.b32.xlu0 %v5168_v1, %s4964_s18 }
 0x799   :  { %1051 = vrot.lane.b32.xlu0 %v5168_v1, %s4965_s19 }
 0x80c   :  { %v813_v19 = vpop.xlane.xlu0 %812 }
 0x80d   :  { %4855 = vrcp.f32 %v813_v19 }
 0x810   :  { %v816_v20 = vpop.xlane.xlu1 %815  ;;  %v1054_v17 = vpop.permute.xlu0 %1053 }
 0x811   :  { %4857 = vrcp.f32 %v816_v20 }
 0x814   :  { %v974_v24 = vpop.permute.xlu1 %973  ;;  %v1052_v27 = vpop.permute.xlu0 %1051 }
 0x817   :  { %v4856_v21 = vpop.eup %4855 }
 0x818   :  { %v819_v22 = vmul.f32 %v4856_v21, %v4852_v9 }
 0x81a   :  { %4395 = vmatmul.mubr.msk.f32.vlgmr.msra.gmra.mrb[6].mxu0 %vm309_vm5, %v819_v22 }
 0x81b   :  { %v4858_v16 = vpop.eup %4857  ;;  %4403 = vmatpush3.xpose.msk.msra.mxu0 %vm309_vm5, %v976_v18  ;;  %4404 = vmatprep.mubr.msk.f32.mxu0 %vm4957_vm4, %v4956_v15 }
 0x81c   :  { %v820_v23 = vmul.f32 %v4858_v16, %v4854_v12  ;;  %4412 = vmatprep.subr.mxu0 %v4956_v15 }
 0x81e   :  { %4400 = vmatmul.mubr.msk.f32.vlgmr.msra.gmra.mrb[10].mxu1 %vm309_vm5, %v820_v23  ;;  %4405 = vmatmul.mubr.msk.f32.vlgmr.msra.gmra.mrb[8].mxu0 %vm309_vm5, %v974_v24 }
 0x81f   :  { %4408 = vmatpush3.xpose.msk.msra.mxu1 %vm309_vm5, %v1054_v17  ;;  %4409 = vmatprep.mubr.msk.f32.mxu1 %vm4957_vm4, %v4956_v15 }
 0x820   :  { %4417 = vmatprep.subr.mxu1 %v4956_v15  ;;  %4414 = vmatprep.mubr.msk.f32.mxu0 %vm4957_vm4, %v4956_v15 }
 0x822   :  { %4410 = vmatmul.mubr.msk.f32.vlgmr.msra.gmra.mrb[12].mxu1 %vm309_vm5, %v1052_v27 }
 0x823   :  { %4419 = vmatprep.mubr.msk.f32.mxu1 %vm4957_vm4, %v4956_v15 }
 0x8ed   :  { %v5264_v28 = vpop.f32.mrb[6].mxu0 }
 0x8ee   :  { %v4396_v29 = vpop.f32.mrb[7].mxu0 }
 0x8f1   :  { %v5266_v30 = vpop.f32.mrb[10].mxu1  ;;  %v1047_v31 = vpop.f32.mrb[8].mxu0 }
 0x8f2   :  { %v1129_v32 = vmul.f32 0.35355338, %v1047_v31  ;;  %v4401_v33 = vpop.f32.mrb[11].mxu1  ;;  %v4406_v34 = vpop.f32.mrb[9].mxu0 }
 0x8f4   :  { %v1131_v35 = vadd.f32 %v1129_v32, %v5186_v6 }
 0x8f5   :  { %v1125_v36 = vpop.f32.mrb[12].mxu1 }
 0x8f6   :  { %v1130_v37 = vmul.f32 0.35355338, %v1125_v36  ;;  %v4411_v38 = vpop.f32.mrb[13].mxu1  ;;  %v1133_v39 = vsel %vm309_vm5, %v1131_v35, -inf }
 0x8f7   :  { %1134 = vmax.xlane.f32.xlu1 %v1133_v39 }
 0x8f8   :  { %v1132_v40 = vadd.f32 %v1130_v37, %v5186_v6 }
 0x8fa   :  { %v1136_v41 = vsel %vm309_vm5, %v1132_v40, -inf }
 0x8fb   :  { %1137 = vmax.xlane.f32.xlu0 %v1136_v41 }
 0x908   :  { %1231 = vrot.lane.b32.xlu1 %v5168_v1, %s5821_s1 }
 0x90c   :  { %1309 = vrot.lane.b32.xlu1 %v5164_v0, %s5819_s20 }
 0x911   :  { %1155 = vrot.lane.b32.xlu0 %v5164_v0, %s5821_s1 }
 0x984   :  { %v1135_v42 = vpop.xlane.xlu1 %1134 }
 0x985   :  { %v1139_v43 = vsub.f32 %v1131_v35, %v1135_v42 }
 0x987   :  { %v1141_v44 = vmul.f32 1.442695, %v1139_v43  ;;  %v1674_v43 = vld [vmem:[%s5795_s7 + $0x8] sm:$0xff] }
 0x988   :  { %v1138_v45 = vpop.xlane.xlu0 %1137  ;;  %v1232_v47 = vpop.permute.xlu1 %1231 }
 0x989   :  { %4859 = vpow2.f32 %v1141_v44  ;;  %v1140_v49 = vsub.f32 %v1132_v40, %v1138_v45  ;;  %4418 = vmatpush3.msra.mxu1 %v1232_v47  ;;  %v1675_v45 = vld [vmem:[%s5795_s7 + $0x10] sm:$0xff]  ;;  %v1676_v47 = vld [vmem:[%s5795_s7 + $0x18] sm:$0xff] }
 0x98a   :  { %4427 = vmatprep.subr.mxu1 %v4956_v15 }
 0x98b   :  { %v1143_v50 = vmul.f32 1.442695, %v1140_v49  ;;  %v4694_v49 = vpack.c.bf16 %v1676_v47, %v1675_v45  ;;  %v4085_v45 = vld [vmem:[%s5798_s10] ss:$0 sm:$0xff] }
 0x98c   :  { %v1156_v51 = vpop.permute.xlu0 %1155  ;;  %v1310_v56 = vpop.permute.xlu1 %1309 }
 0x98d   :  { %4861 = vpow2.f32 %v1143_v50  ;;  %4413 = vmatpush3.msra.mxu0 %v1156_v51 }
 0x98e   :  { %4422 = vmatprep.subr.mxu0 %v4956_v15 }
 0x993   :  { %v4860_v52 = vpop.eup %4859 }
 0x994   :  { %v1145_v53 = vsel %vm309_vm5, %v4860_v52, 0.0 }
 0x995   :  { %1146 = vadd.xlane.f32.xlu0 %v1145_v53 }
 0x997   :  { %v4862_v54 = vpop.eup %4861 }
 0x998   :  { %v1148_v55 = vsel %vm309_vm5, %v4862_v54, 0.0 }
 0x999   :  { %1149 = vadd.xlane.f32.xlu1 %v1148_v55 }
 0x9aa   :  { %1307 = vrot.lane.b32.xlu1 %v5164_v0, %s5815_s21 }
 0x9ab   :  { %1387 = vrot.lane.b32.xlu0 %v5168_v1, %s5819_s20  ;;  %s5835_s20 = smov 24  }
 0x9af   :  { %1385 = vrot.lane.b32.xlu0 %v5168_v1, %s5815_s21 }
 0xa22   :  { %v1147_v57 = vpop.xlane.xlu0 %1146 }
 0xa23   :  { %4863 = vrcp.f32 %v1147_v57 }
 0xa26   :  { %v1150_v58 = vpop.xlane.xlu1 %1149  ;;  %v1388_v62 = vpop.permute.xlu0 %1387 }
 0xa27   :  { %4865 = vrcp.f32 %v1150_v58 }
 0xa2a   :  { %v1308_v2 = vpop.permute.xlu1 %1307  ;;  %v1386_v3 = vpop.permute.xlu0 %1385 }
 0xa2d   :  { %v4864_v59 = vpop.eup %4863 }
 0xa2e   :  { %v1153_v60 = vmul.f32 %v4864_v59, %v4860_v52 }
 0xa30   :  { %4415 = vmatmul.mubr.msk.f32.vlgmr.msra.gmra.mrb[10].mxu0 %vm309_vm5, %v1153_v60 }
 0xa31   :  { %v4866_v61 = vpop.eup %4865  ;;  %4423 = vmatpush3.xpose.msk.msra.mxu0 %vm309_vm5, %v1310_v56  ;;  %4424 = vmatprep.mubr.msk.f32.mxu0 %vm4957_vm4, %v4956_v15 }
 0xa32   :  { %v1154_v63 = vmul.f32 %v4866_v61, %v4862_v54  ;;  %4432 = vmatprep.subr.mxu0 %v4956_v15 }
 0xa34   :  { %4420 = vmatmul.mubr.msk.f32.vlgmr.msra.gmra.mrb[14].mxu1 %vm309_vm5, %v1154_v63  ;;  %4425 = vmatmul.mubr.msk.f32.vlgmr.msra.gmra.mrb[12].mxu0 %vm309_vm5, %v1308_v2 }
 0xa35   :  { %4428 = vmatpush3.xpose.msk.msra.mxu1 %vm309_vm5, %v1388_v62  ;;  %4429 = vmatprep.mubr.msk.f32.mxu1 %vm4957_vm4, %v4956_v15 }
 0xa36   :  { %4437 = vmatprep.subr.mxu1 %v4956_v15  ;;  %4434 = vmatprep.mubr.msk.f32.mxu0 %vm4957_vm4, %v4956_v15 }
 0xa38   :  { %4430 = vmatmul.mubr.msk.f32.vlgmr.msra.gmra.mrb[16].mxu1 %vm309_vm5, %v1386_v3 }
 0xa39   :  { %4439 = vmatprep.mubr.msk.f32.mxu1 %vm4957_vm4, %v4956_v15 }
 0xb03   :  { %v1227_v4 = vpop.f32.mrb[10].mxu0 }
 0xb04   :  { %v4416_v5 = vpop.f32.mrb[11].mxu0 }
 0xb07   :  { %v1303_v9 = vpop.f32.mrb[14].mxu1  ;;  %v1381_v10 = vpop.f32.mrb[12].mxu0 }
 0xb08   :  { %v1463_v12 = vmul.f32 0.35355338, %v1381_v10  ;;  %v4421_v13 = vpop.f32.mrb[15].mxu1  ;;  %v4426_v18 = vpop.f32.mrb[13].mxu0 }
 0xb0a   :  { %v1465_v19 = vadd.f32 %v1463_v12, %v5186_v6 }
 0xb0b   :  { %v1459_v20 = vpop.f32.mrb[16].mxu1 }
 0xb0c   :  { %v1464_v21 = vmul.f32 0.35355338, %v1459_v20  ;;  %v4431_v22 = vpop.f32.mrb[17].mxu1  ;;  %v1467_v16 = vsel %vm309_vm5, %v1465_v19, -inf }
 0xb0d   :  { %1468 = vmax.xlane.f32.xlu1 %v1467_v16 }
 0xb0e   :  { %v1466_v17 = vadd.f32 %v1464_v21, %v5186_v6 }
 0xb10   :  { %v1470_v23 = vsel %vm309_vm5, %v1466_v17, -inf }
 0xb11   :  { %1471 = vmax.xlane.f32.xlu0 %v1470_v23 }
 0xb9a   :  { %v1469_v24 = vpop.xlane.xlu1 %1468 }
 0xb9b   :  { %v1473_v27 = vsub.f32 %v1465_v19, %v1469_v24 }
 0xb9d   :  { %v1475_v29 = vmul.f32 1.442695, %v1473_v27  ;;  %v1811_v27 = vld [vmem:[%s5799_s11] sm:$0xff] }
 0xb9e   :  { %v1472_v31 = vpop.xlane.xlu0 %1471 }
 0xb9f   :  { %4867 = vpow2.f32 %v1475_v29  ;;  %v1474_v32 = vsub.f32 %v1466_v17, %v1472_v31  ;;  %v1812_v29 = vld [vmem:[%s5799_s11 + $0x8] sm:$0xff] }
 0xba0   :  { %v4698_v31 = vpack.c.bf16 %v1812_v29, %v1811_v27 }
 0xba1   :  { %v1477_v33 = vmul.f32 1.442695, %v1474_v32  ;;  %v1813_v32 = vld [vmem:[%s5799_s11 + $0x10] sm:$0xff] }
 0xba3   :  { %4869 = vpow2.f32 %v1477_v33  ;;  %v1814_v33 = vld [vmem:[%s5799_s11 + $0x18] sm:$0xff] }
 0xba9   :  { %v4868_v34 = vpop.eup %4867 }
 0xbaa   :  { %v1479_v35 = vsel %vm309_vm5, %v4868_v34, 0.0 }
 0xbab   :  { %1480 = vadd.xlane.f32.xlu0 %v1479_v35  ;;  %v1921_v35 = vld [vmem:[%s5801_s13] sm:$0xff] }
 0xbad   :  { %v4870_v36 = vpop.eup %4869 }
 0xbae   :  { %v1482_v37 = vsel %vm309_vm5, %v4870_v36, 0.0 }
 0xbaf   :  { %1483 = vadd.xlane.f32.xlu1 %v1482_v37 }
 0xbc0   :  { %1565 = vrot.lane.b32.xlu1 %v5168_v1, %s5813_s22 }
 0xbc1   :  { %1489 = vrot.lane.b32.xlu0 %v5164_v0, %s5813_s22 }
 0xbc4   :  { %1643 = vrot.lane.b32.xlu1 %v5264_v28, %s5811_s23 }
 0xbc5   :  { %1645 = vrot.lane.b32.xlu0 %v5266_v30, %s5811_s23  ;;  %v1673_v30 = vld [vmem:[%s5795_s7] sm:$0xff] }
 0xbc6   :  { %v4690_v44 = vpack.c.bf16 %v1674_v43, %v1673_v30 }
 0xbc8   :  { %1651 = vrot.lane.b32.xlu1 %v1227_v4, %s5809_s24 }
 0xbc9   :  { %1653 = vrot.lane.b32.xlu0 %v1303_v9, %s5809_s24 }
 0xc38   :  { %v1481_v38 = vpop.xlane.xlu0 %1480 }
 0xc39   :  { %4871 = vrcp.f32 %v1481_v38 }
 0xc3c   :  { %v1490_v39 = vpop.permute.xlu0 %1489  ;;  %v1484_v40 = vpop.xlane.xlu1 %1483 }
 0xc3d   :  { %4873 = vrcp.f32 %v1484_v40  ;;  %4433 = vmatpush3.msra.mxu0 %v1490_v39 }
 0xc3e   :  { %4691 = vmatprep.subr.bf16.mxu0 %v4690_v44 }
 0xc40   :  { %v1566_v1 = vpop.permute.xlu1 %1565  ;;  %v1646_v55 = vpop.permute.xlu0 %1645 }
 0xc41   :  { %4438 = vmatpush3.msra.mxu1 %v1566_v1  ;;  %v1666_v62 = vsel %vm309_vm5, %v5226_v48, %v1646_v55  ;;  %v1925_v55 = vld [vmem:[%s5801_s13 + $0x20] sm:$0xff] }
 0xc42   :  { %4699 = vmatprep.subr.bf16.mxu1 %v4698_v31 }
 0xc43   :  { %v4872_v0 = vpop.eup %4871 }
 0xc44   :  { %v1487_v41 = vmul.f32 %v4872_v0, %v4868_v34  ;;  %v1644_v54 = vpop.permute.xlu1 %1643  ;;  %v1654_v58 = vpop.permute.xlu0 %1653  ;;  %v4702_v34 = vpack.c.bf16 %v1814_v33, %v1813_v32 }
 0xc45   :  { %v1665_v57 = vsel %vm309_vm5, %v5224_v46, %v1644_v54  ;;  %v1669_v63 = vsel %vm1667_vm8, %v1666_v62, %v1654_v58  ;;  %v4081_v46 = vld [vmem:[%s5796_s8] ss:$0 sm:$0xff]  ;;  %v1927_v58 = vld [vmem:[%s5801_s13 + $0x30] sm:$0xff]  ;;  %v1930_v62 = vld [vmem:[%s5801_s13 + $0x48] sm:$0xff] }
 0xc46   :  { %4435 = vmatmul.mubr.msk.f32.vlgmr.msra.gmra.mrb[14].mxu0 %vm309_vm5, %v1487_v41 }
 0xc47   :  { %v4874_v28 = vpop.eup %4873  ;;  %4693 = vmatpush3.bf16.msra.mxu0 %v4690_v44 }
 0xc48   :  { %v1488_v42 = vmul.f32 %v4874_v28, %v4870_v36  ;;  %4695 = vmatprep.subr.bf16.mxu0 %v4694_v49  ;;  %v1652_v56 = vpop.permute.xlu1 %1651  ;;  %v1922_v36 = vld [vmem:[%s5801_s13 + $0x8] sm:$0xff] }
 0xc49   :  { %v1668_v59 = vsel %vm1667_vm8, %v1665_v57, %v1652_v56  ;;  %v4706_v37 = vpack.c.bf16 %v1922_v36, %v1921_v35  ;;  %v1926_v56 = vld [vmem:[%s5801_s13 + $0x28] sm:$0xff] }
 0xc4a   :  { %4440 = vmatmul.mubr.msk.f32.vlgmr.msra.gmra.mrb[18].mxu1 %vm309_vm5, %v1488_v42  ;;  %v4084_v42 = vld [vmem:[%s5797_s9] ss:$0 sm:$0xff]  ;;  %v4714_v57 = vpack.c.bf16 %v1926_v56, %v1925_v55 }
 0xc4b   :  { %4697 = vmatpush3.bf16.msra.mxu0 %v4694_v49  ;;  %4701 = vmatpush3.bf16.msra.mxu1 %v4698_v31 }
 0xc4c   :  { %4703 = vmatprep.subr.bf16.mxu1 %v4702_v34  ;;  %4707 = vmatprep.subr.bf16.mxu0 %v4706_v37 }
 0xc4f   :  { %4705 = vmatpush3.bf16.msra.mxu1 %v4702_v34 }
 0xd19   :  { %v1561_v50 = vpop.f32.mrb[14].mxu0 }
 0xd1a   :  { %1659 = vrot.lane.b32.xlu1 %v1561_v50, %s5817_s25  ;;  %v4436_v51 = vpop.f32.mrb[15].mxu0 }
 0xd1d   :  { %v1637_v52 = vpop.f32.mrb[18].mxu1 }
 0xd1e   :  { %1661 = vrot.lane.b32.xlu0 %v1637_v52, %s5817_s25  ;;  %v4441_v53 = vpop.f32.mrb[19].mxu1  ;;  %v1923_v52 = vld [vmem:[%s5801_s13 + $0x10] sm:$0xff] }
 0xd1f   :  { %v1924_v53 = vld [vmem:[%s5801_s13 + $0x18] sm:$0xff] }
 0xd20   :  { %v4710_v54 = vpack.c.bf16 %v1924_v53, %v1923_v52 }
 0xd8c   :  { %v1660_v60 = vpop.permute.xlu1 %1659 }
 0xd8d   :  { %v1671_v61 = vsel %vm1670_vm7, %v1668_v59, %v1660_v60  ;;  %v1928_v59 = vld [vmem:[%s5801_s13 + $0x38] sm:$0xff] }
 0xd8e   :  { %4450 = vmatprep.mubr.msk.f32.mxu0 %vm170_vm3, %v1671_v61  ;;  %v4718_v60 = vpack.c.bf16 %v1928_v59, %v1927_v58  ;;  %v1929_v61 = vld [vmem:[%s5801_s13 + $0x40] sm:$0xff]  ;;  %v4095_v58 = vld [vmem:[%s5793_s5 + $0x28] sm:$0xff] }
 0xd90   :  { %v1662_v2 = vpop.permute.xlu0 %1661 }
 0xd91   :  { %v1672_v3 = vsel %vm1670_vm7, %v1669_v63, %v1662_v2  ;;  %v4722_v63 = vpack.c.bf16 %v1930_v62, %v1929_v61  ;;  %v1931_v2 = vld [vmem:[%s5801_s13 + $0x50] sm:$0xff]  ;;  %v4097_v61 = vld [vmem:[%s5793_s5 + $0x38] sm:$0xff] }
 0xd92   :  { %4451 = vmatmul.mubr.msk.f32.vlgmr.msra.gmra.mrb[16].mxu0 %vm170_vm3, %v1672_v3  ;;  %v1932_v3 = vld [vmem:[%s5801_s13 + $0x58] sm:$0xff] }
 0xd93   :  { %4709 = vmatpush3.bf16.msra.mxu0 %v4706_v37 }
 0xd94   :  { %4711 = vmatprep.subr.bf16.mxu0 %v4710_v54 }
 0xd97   :  { %4713 = vmatpush3.bf16.msra.mxu0 %v4710_v54 }
 0xd98   :  { %4715 = vmatprep.subr.bf16.mxu0 %v4714_v57 }
 0xd9b   :  { %4717 = vmatpush3.bf16.msra.mxu0 %v4714_v57  ;;  %v4094_v57 = vld [vmem:[%s5793_s5 + $0x20] sm:$0xff] }
 0xd9c   :  { %4719 = vmatprep.subr.bf16.mxu0 %v4718_v60  ;;  %v4738_v59 = vpack.c.bf16 %v4095_v58, %v4094_v57 }
 0xd9e   :  { %4739 = vmatprep.subr.bf16.mxu1 %v4738_v59 }
 0xd9f   :  { %4721 = vmatpush3.bf16.msra.mxu0 %v4718_v60  ;;  %v4096_v60 = vld [vmem:[%s5793_s5 + $0x30] sm:$0xff]  ;;  %s4973_s5 = smov [#allocation2]  }
 0xda0   :  { %4723 = vmatprep.subr.bf16.mxu0 %v4722_v63  ;;  %v4742_v62 = vpack.c.bf16 %v4097_v61, %v4096_v60  ;;  %s4037_s25 = sshll.u32 %s4973_s5, 4  ;;  %s4038_s25 = int_to_ptr.vmem [resolvable:$true] %s4037_s25 }
 0xda1   :  { %p4936_p1 = scmp.lt.s32.totalorder %s4038_s25, %s4038_s25 }
 0xda3   :  { %4725 = vmatpush3.bf16.msra.mxu0 %v4722_v63 }
 0xe65   :  { %v4452_v4 = vpop.f32.mrb[16].mxu0 }
 0xe66   :  { %v1762_v5 = vadd.f32 %v4452_v4, %v4081_v46  ;;  %v1756_v9 = vpop.f32.mrb[17].mxu0  ;;  %v1933_v4 = vld [vmem:[%s5801_s13 + $0x60] sm:$0xff] }
 0xe67   :  { %v1757_v10 = vadd.f32 %v4081_v46, %v1756_v9  ;;  %v4726_v46 = vpack.c.bf16 %v1932_v3, %v1931_v2 }
 0xe68   :  { %v5350_v12 = vadd.f32 %v1762_v5, %v5126_v26  ;;  %v1934_v5 = vld [vmem:[%s5801_s13 + $0x68] sm:$0xff] }
 0xe69   :  { %v5353_v48 = vadd.f32 %v1757_v10, %v5124_v25  ;;  %4727 = vmatprep.subr.bf16.mxu0 %v4726_v46  ;;  %v4730_v9 = vpack.c.bf16 %v1934_v5, %v1933_v4  ;;  %v1935_v10 = vld [vmem:[%s5801_s13 + $0x70] sm:$0xff] }
 0xe6a   :  { %v1772_v13 = vsel %vm170_vm3, %v5350_v12, 0.0  ;;  %4729 = vmatpush3.bf16.msra.mxu0 %v4726_v46 }
 0xe6b   :  { %1773 = vadd.xlane.f32.xlu0 %v1772_v13  ;;  %v1769_v18 = vsel %vm170_vm3, %v5353_v48, 0.0  ;;  %v1936_v13 = vld [vmem:[%s5801_s13 + $0x78] sm:$0xff]  ;;  %4731 = vmatprep.subr.bf16.mxu0 %v4730_v9 }
 0xe6c   :  { %1770 = vadd.xlane.f32.xlu1 %v1769_v18  ;;  %v4734_v18 = vpack.c.bf16 %v1936_v13, %v1935_v10  ;;  %v4092_v10 = vld [vmem:[%s5791_s3 + $0x1] ss:$0 sm:$0xff] }
 0xe6e   :  { %4733 = vmatpush3.bf16.msra.mxu0 %v4730_v9 }
 0xe6f   :  { %4735 = vmatprep.subr.bf16.mxu0 %v4734_v18 }
 0xe72   :  { %4737 = vmatpush3.bf16.msra.mxu0 %v4734_v18 }
 0xe73   :  { %4540 = vmatprep.subr.mxu0 %v4956_v15 }
 0xef8   :  { %v1774_v19 = vpop.xlane.xlu0 %1773 }
 0xef9   :  { %v1776_v20 = vmul.f32 0.03125, %v1774_v19  ;;  %v1771_v21 = vpop.xlane.xlu1 %1770  ;;  %v4086_v19 = vld [vmem:[%s5828_s26] ss:$0 sm:$0xff] }
 0xefa   :  { %v1775_v22 = vmul.f32 0.03125, %v1771_v21 }
 0xefb   :  { %v1778_v16 = vsub.f32 %v5350_v12, %v1776_v20 }
 0xefc   :  { %v1777_v26 = vsub.f32 %v5353_v48, %v1775_v22 }
 0xefd   :  { %v1780_v17 = vmul.f32 %v1778_v16, %v1778_v16 }
 0xefe   :  { %v1779_v23 = vmul.f32 %v1777_v26, %v1777_v26 }
 0xeff   :  { %v1784_v25 = vsel %vm170_vm3, %v1780_v17, 0.0 }
 0xf00   :  { %1785 = vadd.xlane.f32.xlu1 %v1784_v25  ;;  %v1781_v24 = vsel %vm170_vm3, %v1779_v23, 0.0 }
 0xf01   :  { %1782 = vadd.xlane.f32.xlu0 %v1781_v24 }
 0xf8d   :  { %v1786_v38 = vpop.xlane.xlu1 %1785 }
 0xf8e   :  { %v1788_v39 = vmul.f32 0.03125, %v1786_v38  ;;  %v1783_v40 = vpop.xlane.xlu0 %1782 }
 0xf8f   :  { %v1787_v1 = vmul.f32 0.03125, %v1783_v40 }
 0xf90   :  { %v1790_v0 = vadd.f32 1e-05, %v1788_v39 }
 0xf91   :  { %v1789_v41 = vadd.f32 1e-05, %v1787_v1 }
 0xf92   :  { %4875 = vrsqrt.f32 %v1790_v0  ;;  %v4089_v0 = vld [vmem:[%s5802_s14] ss:$0 sm:$0xff] }
 0xf93   :  { %4877 = vrsqrt.f32 %v1789_v41 }
 0xf9c   :  { %v4876_v28 = vpop.eup %4875 }
 0xf9d   :  { %v4878_v30 = vpop.eup %4877  ;;  %v1794_v43 = vmul.f32 %v4876_v28, %v1778_v16 }
 0xf9e   :  { %v1793_v44 = vmul.f32 %v4878_v30, %v1777_v26 }
 0xf9f   :  { %v1802_v47 = vmul.f32 %v4084_v42, %v1794_v43 }
 0xfa0   :  { %v1801_v49 = vmul.f32 %v4084_v42, %v1793_v44 }
 0xfa1   :  { %v1810_v51 = vadd.f32 %v4085_v45, %v1802_v47 }
 0xfa2   :  { %v1809_v50 = vadd.f32 %v4085_v45, %v1801_v49 }
 0xfa4   :  { %4461 = vmatprep.mubr.msk.f32.mxu1 %vm170_vm3, %v1809_v50 }
 0xfa5   :  { %4462 = vmatmul.mubr.msk.f32.vlgmr.msra.gmra.mrb[20].mxu1 %vm170_vm3, %v1810_v51 }
 0xfa6   :  { %4741 = vmatpush3.bf16.msra.mxu1 %v4738_v59 }
 0xfa7   :  { %4743 = vmatprep.subr.bf16.mxu1 %v4742_v62 }
 0xfaa   :  { %4745 = vmatpush3.bf16.msra.mxu1 %v4742_v62 }
 0xfab   :  { %4510 = vmatprep.subr.mxu1 %v4956_v15 }
0x1078   :  { %v4463_v20 = vpop.f32.mrb[20].mxu1 }
0x1079   :  { %v1900_v21 = vadd.f32 %v4463_v20, %v4086_v19  ;;  %v1894_v22 = vpop.f32.mrb[21].mxu1  ;;  %v4093_v20 = vld [vmem:[%s5792_s4 + $0x1] ss:$0 sm:$0xff]  ;;  %s5829_s4 = smov 48  }
0x107a   :  { %v1895_v16 = vadd.f32 %v4086_v19, %v1894_v22 }
0x107b   :  { %v1906_v26 = vmul.f32 0.044715, %v1900_v21  ;;  %v1904_v39 = vmul.f32 0.5, %v1900_v21 }
0x107c   :  { %v1905_v17 = vmul.f32 0.044715, %v1895_v16  ;;  %v1903_v37 = vmul.f32 0.5, %v1895_v16 }
0x107d   :  { %v1908_v23 = vmul.f32 %v1906_v26, %v1900_v21 }
0x107e   :  { %v1907_v25 = vmul.f32 %v1905_v17, %v1895_v16  ;;  %v4099_v17 = vld [vmem:[%s5794_s6 + $0x1] ss:$0 sm:$0xff]  ;;  %s5830_s6 = smov 72  }
0x107f   :  { %v1910_v24 = vmul.f32 %v1908_v23, %v1900_v21 }
0x1080   :  { %v1909_v27 = vmul.f32 %v1907_v25, %v1895_v16 }
0x1081   :  { %v1912_v29 = vadd.f32 %v1910_v24, %v1900_v21 }
0x1082   :  { %v1911_v31 = vadd.f32 %v1909_v27, %v1895_v16 }
0x1083   :  { %v1914_v32 = vmul.f32 0.7978846, %v1912_v29 }
0x1084   :  { %v1913_v33 = vmul.f32 0.7978846, %v1911_v31 }
0x1085   :  { %4879 = vtanh.f32 %v1914_v32 }
0x1086   :  { %4881 = vtanh.f32 %v1913_v33 }
0x108f   :  { %v4880_v34 = vpop.eup %4879 }
0x1090   :  { %v4882_v35 = vpop.eup %4881  ;;  %v1918_v36 = vadd.f32 1.0, %v4880_v34 }
0x1091   :  { %v1917_v38 = vadd.f32 1.0, %v4882_v35 }
0x1092   :  { %v1920_v1 = vmul.f32 %v1918_v36, %v1904_v39 }
0x1093   :  { %v1919_v40 = vmul.f32 %v1917_v38, %v1903_v37 }
0x1095   :  { %4496 = vmatprep.mubr.f32.mxu0 %v1919_v40 }
0x1096   :  { %4497 = vmatmul.mubr.f32.vlgmr.msra.gmra.mrb[18].mxu0 %v1920_v1 }
0x1097   :  { %4542 = vmatprep.mubr.msk.f32.mxu0 %vm4957_vm4, %v4956_v15 }
0x1169   :  { %v4498_v41 = vpop.f32.mrb[18].mxu0 }
0x116a   :  { %v2016_v28 = vadd.f32 %v4498_v41, %v4089_v0  ;;  %v2010_v42 = vpop.f32.mrb[19].mxu0 }
0x116b   :  { %v2011_v30 = vadd.f32 %v4089_v0, %v2010_v42 }
0x116c   :  { %v5441_v43 = vadd.f32 %v2016_v28, %v5350_v12 }
0x116d   :  { %v5444_v44 = vadd.f32 %v2011_v30, %v5353_v48 }
0x116e   :  { %v2028_v45 = vsel %vm170_vm3, %v5441_v43, 0.0 }
0x116f   :  { %2029 = vadd.xlane.f32.xlu1 %v2028_v45  ;;  %v2025_v47 = vsel %vm170_vm3, %v5444_v44, 0.0 }
0x1170   :  { %2026 = vadd.xlane.f32.xlu0 %v2025_v47 }
0x11fc   :  { %v2030_v49 = vpop.xlane.xlu1 %2029 }
0x11fd   :  { %v2032_v50 = vmul.f32 0.03125, %v2030_v49  ;;  %v2027_v51 = vpop.xlane.xlu0 %2026 }
0x11fe   :  { %v2031_v52 = vmul.f32 0.03125, %v2027_v51 }
0x11ff   :  { %v2034_v53 = vsub.f32 %v5441_v43, %v2032_v50 }
0x1200   :  { %v2033_v12 = vsub.f32 %v5444_v44, %v2031_v52 }
0x1201   :  { %v2036_v54 = vmul.f32 %v2034_v53, %v2034_v53 }
0x1202   :  { %v2035_v55 = vmul.f32 %v2033_v12, %v2033_v12 }
0x1203   :  { %v2040_v48 = vsel %vm170_vm3, %v2036_v54, 0.0 }
0x1204   :  { %2041 = vadd.xlane.f32.xlu1 %v2040_v48  ;;  %v2037_v56 = vsel %vm170_vm3, %v2035_v55, 0.0 }
0x1205   :  { %2038 = vadd.xlane.f32.xlu0 %v2037_v56 }
0x1291   :  { %v2042_v63 = vpop.xlane.xlu1 %2041 }
0x1292   :  { %v2044_v2 = vmul.f32 0.03125, %v2042_v63  ;;  %v2039_v3 = vpop.xlane.xlu0 %2038 }
0x1293   :  { %v2043_v46 = vmul.f32 0.03125, %v2039_v3 }
0x1294   :  { %v2046_v4 = vadd.f32 1e-05, %v2044_v2 }
0x1295   :  { %v2045_v5 = vadd.f32 1e-05, %v2043_v46 }
0x1296   :  { %4883 = vrsqrt.f32 %v2046_v4 }
0x1297   :  { %4885 = vrsqrt.f32 %v2045_v5 }
0x12a0   :  { %v4884_v9 = vpop.eup %4883 }
0x12a1   :  { %v4886_v13 = vpop.eup %4885  ;;  %v2050_v18 = vmul.f32 %v4884_v9, %v2034_v53 }
0x12a2   :  { %v2049_v19 = vmul.f32 %v4886_v13, %v2033_v12 }
0x12a3   :  { %v2058_v21 = vmul.f32 %v4092_v10, %v2050_v18 }
0x12a4   :  { %v2057_v22 = vmul.f32 %v4092_v10, %v2049_v19 }
0x12a5   :  { %v2066_v26 = vadd.f32 %v4093_v20, %v2058_v21 }
0x12a6   :  { %v2065_v16 = vadd.f32 %v4093_v20, %v2057_v22 }
0x12a8   :  { %4507 = vmatprep.mubr.msk.f32.mxu1 %vm170_vm3, %v2065_v16 }
0x12a9   :  { %4508 = vmatmul.mubr.msk.f32.vlgmr.msra.gmra.mrb[22].mxu1 %vm170_vm3, %v2066_v26 }
0x12aa   :  { %4512 = vmatprep.mubr.msk.f32.mxu1 %vm4957_vm4, %v4956_v15 }
0x137c   :  { %v4509_v23 = vpop.f32.mrb[22].mxu1 }
0x137d   :  { %v5480_v25 = vadd.f32 %v4509_v23, %v4099_v17  ;;  %v2152_v24 = vpop.f32.mrb[23].mxu1 }
0x137e   :  { %v5482_v27 = vadd.f32 %v4099_v17, %v2152_v24 }
0x137f   :  { %2239 = vrot.lane.b32.xlu1 %v5480_v25, %s4958_s29 }
0x1380   :  { %2162 = vrot.lane.b32.xlu0 %v5482_v27, %s4958_s29  ;;  %s5831_s29 = smov 104  }
0x13f1   :  { %v2240_v31 = vpop.permute.xlu1 %2239 }
0x13f2   :  { %v2163_v29 = vpop.permute.xlu0 %2162 }
0x13f3   :  { %4511 = vmatpush3.xpose.msk.msra.mxu1 %vm309_vm5, %v2163_v29 }
0x13f4   :  { %4515 = vmatprep.subr.mxu1 %v4956_v15 }
0x13f6   :  { %4513 = vmatmul.mubr.msk.f32.vlgmr.msra.gmra.mrb[24].mxu1 %vm309_vm5, %v5482_v27 }
0x13f7   :  { %4516 = vmatpush3.xpose.msk.msra.mxu1 %vm309_vm5, %v2240_v31  ;;  %4517 = vmatprep.mubr.msk.f32.mxu1 %vm4957_vm4, %v4956_v15 }
0x13f8   :  { %4520 = vmatprep.subr.mxu1 %v4956_v15 }
0x13fa   :  { %4518 = vmatmul.mubr.msk.f32.vlgmr.msra.gmra.mrb[26].mxu1 %vm309_vm5, %v5480_v25 }
0x13fb   :  { %4522 = vmatprep.mubr.msk.f32.mxu1 %vm4957_vm4, %v4956_v15 }
0x14c9   :  { %v2234_v32 = vpop.f32.mrb[24].mxu1 }
0x14ca   :  { %v2315_v33 = vmul.f32 0.35355338, %v2234_v32  ;;  %v4514_v34 = vpop.f32.mrb[25].mxu1 }
0x14cc   :  { %v2317_v35 = vadd.f32 %v2315_v33, %v5186_v6 }
0x14cd   :  { %v2311_v36 = vpop.f32.mrb[26].mxu1 }
0x14ce   :  { %v2316_v37 = vmul.f32 0.35355338, %v2311_v36  ;;  %v4519_v38 = vpop.f32.mrb[27].mxu1  ;;  %v2319_v39 = vsel %vm309_vm5, %v2317_v35, -inf }
0x14cf   :  { %2320 = vmax.xlane.f32.xlu1 %v2319_v39 }
0x14d0   :  { %v2318_v40 = vadd.f32 %v2316_v37, %v5186_v6 }
0x14d2   :  { %v2322_v1 = vsel %vm309_vm5, %v2318_v40, -inf }
0x14d3   :  { %2323 = vmax.xlane.f32.xlu0 %v2322_v1 }
0x14e0   :  { %2417 = vrot.lane.b32.xlu1 %v5480_v25, %s4960_s12 }
0x14e4   :  { %2495 = vrot.lane.b32.xlu1 %v5482_v27, %s4961_s0 }
0x155c   :  { %v2321_v0 = vpop.xlane.xlu1 %2320 }
0x155d   :  { %v2325_v41 = vsub.f32 %v2317_v35, %v2321_v0 }
0x155f   :  { %v2327_v28 = vmul.f32 1.442695, %v2325_v41 }
0x1560   :  { %v2324_v42 = vpop.xlane.xlu0 %2323  ;;  %v2418_v52 = vpop.permute.xlu1 %2417 }
0x1561   :  { %4887 = vpow2.f32 %v2327_v28  ;;  %v2326_v30 = vsub.f32 %v2318_v40, %v2324_v42 }
0x1563   :  { %v2329_v45 = vmul.f32 1.442695, %v2326_v30 }
0x1564   :  { %v2496_v53 = vpop.permute.xlu1 %2495 }
0x1565   :  { %4889 = vpow2.f32 %v2329_v45 }
0x156b   :  { %v4888_v47 = vpop.eup %4887 }
0x156c   :  { %v2331_v49 = vsel %vm309_vm5, %v4888_v47, 0.0 }
0x156d   :  { %2332 = vadd.xlane.f32.xlu0 %v2331_v49 }
0x156f   :  { %v4890_v50 = vpop.eup %4889 }
0x1570   :  { %v2334_v51 = vsel %vm309_vm5, %v4890_v50, 0.0 }
0x1571   :  { %2335 = vadd.xlane.f32.xlu1 %v2334_v51 }
0x1582   :  { %2573 = vrot.lane.b32.xlu1 %v5480_v25, %s4961_s0  ;;  %s5833_s0 = smov 8  }
0x1583   :  { %2341 = vrot.lane.b32.xlu0 %v5482_v27, %s4960_s12  ;;  %s5832_s12 = smov 40  }
0x1587   :  { %2493 = vrot.lane.b32.xlu0 %v5482_v27, %s4962_s2 }
0x158b   :  { %2571 = vrot.lane.b32.xlu0 %v5480_v25, %s4962_s2  ;;  %s5834_s2 = smov 16  }
0x15fa   :  { %v2333_v12 = vpop.xlane.xlu0 %2332 }
0x15fb   :  { %4891 = vrcp.f32 %v2333_v12 }
0x15fe   :  { %v2336_v54 = vpop.xlane.xlu1 %2335  ;;  %v2342_v55 = vpop.permute.xlu0 %2341 }
0x15ff   :  { %4893 = vrcp.f32 %v2336_v54  ;;  %4521 = vmatpush3.msra.mxu1 %v2342_v55 }
0x1600   :  { %4525 = vmatprep.subr.mxu1 %v4956_v15 }
0x1602   :  { %v2494_v59 = vpop.permute.xlu0 %2493  ;;  %v2574_v60 = vpop.permute.xlu1 %2573 }
0x1605   :  { %v4892_v48 = vpop.eup %4891 }
0x1606   :  { %v2339_v56 = vmul.f32 %v4892_v48, %v4888_v47  ;;  %v2572_v61 = vpop.permute.xlu0 %2571 }
0x1608   :  { %4523 = vmatmul.mubr.msk.f32.vlgmr.msra.gmra.mrb[28].mxu1 %vm309_vm5, %v2339_v56 }
0x1609   :  { %v4894_v57 = vpop.eup %4893  ;;  %4526 = vmatpush3.msra.mxu1 %v2418_v52  ;;  %4527 = vmatprep.mubr.msk.f32.mxu1 %vm4957_vm4, %v4956_v15 }
0x160a   :  { %v2340_v58 = vmul.f32 %v4894_v57, %v4890_v50  ;;  %4530 = vmatprep.subr.mxu1 %v4956_v15 }
0x160c   :  { %4528 = vmatmul.mubr.msk.f32.vlgmr.msra.gmra.mrb[30].mxu1 %vm309_vm5, %v2340_v58 }
0x160d   :  { %4532 = vmatprep.mubr.msk.f32.mxu1 %vm4957_vm4, %v4956_v15 }
0x1610   :  { %4531 = vmatpush3.xpose.msk.msra.mxu1 %vm309_vm5, %v2496_v53 }
0x1611   :  { %4535 = vmatprep.subr.mxu1 %v4956_v15 }
0x1613   :  { %4533 = vmatmul.mubr.msk.f32.vlgmr.msra.gmra.mrb[32].mxu1 %vm309_vm5, %v2494_v59 }
0x1614   :  { %4536 = vmatpush3.xpose.msk.msra.mxu1 %vm309_vm5, %v2574_v60  ;;  %4537 = vmatprep.mubr.msk.f32.mxu1 %vm4957_vm4, %v4956_v15 }
0x1615   :  { %4545 = vmatprep.subr.mxu1 %v4956_v15 }
0x1617   :  { %4538 = vmatmul.mubr.msk.f32.vlgmr.msra.gmra.mrb[34].mxu1 %vm309_vm5, %v2572_v61 }
0x1618   :  { %4547 = vmatprep.mubr.msk.f32.mxu1 %vm4957_vm4, %v4956_v15 }
0x16db   :  { %v5536_v62 = vpop.f32.mrb[28].mxu1 }
0x16dc   :  { %v4524_v63 = vpop.f32.mrb[29].mxu1 }
0x16df   :  { %v5538_v2 = vpop.f32.mrb[30].mxu1 }
0x16e0   :  { %v4529_v3 = vpop.f32.mrb[31].mxu1 }
0x16e6   :  { %v2567_v46 = vpop.f32.mrb[32].mxu1 }
0x16e7   :  { %v2649_v4 = vmul.f32 0.35355338, %v2567_v46  ;;  %v4534_v5 = vpop.f32.mrb[33].mxu1 }
0x16e9   :  { %v2651_v9 = vadd.f32 %v2649_v4, %v5186_v6 }
0x16ea   :  { %v2645_v10 = vpop.f32.mrb[34].mxu1 }
0x16eb   :  { %v2650_v13 = vmul.f32 0.35355338, %v2645_v10  ;;  %v4539_v18 = vpop.f32.mrb[35].mxu1  ;;  %v2653_v19 = vsel %vm309_vm5, %v2651_v9, -inf }
0x16ec   :  { %2654 = vmax.xlane.f32.xlu1 %v2653_v19 }
0x16ed   :  { %v2652_v20 = vadd.f32 %v2650_v13, %v5186_v6 }
0x16ef   :  { %v2656_v21 = vsel %vm309_vm5, %v2652_v20, -inf }
0x16f0   :  { %2657 = vmax.xlane.f32.xlu0 %v2656_v21 }
0x16fd   :  { %2751 = vrot.lane.b32.xlu1 %v5480_v25, %s4963_s30 }
0x1701   :  { %2829 = vrot.lane.b32.xlu1 %v5482_v27, %s4964_s18 }
0x1706   :  { %2675 = vrot.lane.b32.xlu0 %v5482_v27, %s4963_s30 }
0x1779   :  { %v2655_v22 = vpop.xlane.xlu1 %2654 }
0x177a   :  { %v2659_v16 = vsub.f32 %v2651_v9, %v2655_v22 }
0x177c   :  { %v2661_v26 = vmul.f32 1.442695, %v2659_v16 }
0x177d   :  { %v2752_v17 = vpop.permute.xlu1 %2751  ;;  %v2658_v23 = vpop.xlane.xlu0 %2657 }
0x177e   :  { %4895 = vpow2.f32 %v2661_v26  ;;  %v2660_v24 = vsub.f32 %v2652_v20, %v2658_v23  ;;  %4546 = vmatpush3.msra.mxu1 %v2752_v17 }
0x177f   :  { %4555 = vmatprep.subr.mxu1 %v4956_v15 }
0x1780   :  { %v2663_v29 = vmul.f32 1.442695, %v2660_v24 }
0x1781   :  { %v2676_v31 = vpop.permute.xlu0 %2675  ;;  %v2830_v36 = vpop.permute.xlu1 %2829 }
0x1782   :  { %4897 = vpow2.f32 %v2663_v29  ;;  %4541 = vmatpush3.msra.mxu0 %v2676_v31 }
0x1783   :  { %4550 = vmatprep.subr.mxu0 %v4956_v15 }
0x1788   :  { %v4896_v32 = vpop.eup %4895 }
0x1789   :  { %v2665_v33 = vsel %vm309_vm5, %v4896_v32, 0.0 }
0x178a   :  { %2666 = vadd.xlane.f32.xlu0 %v2665_v33 }
0x178c   :  { %v4898_v34 = vpop.eup %4897 }
0x178d   :  { %v2668_v35 = vsel %vm309_vm5, %v4898_v34, 0.0 }
0x178e   :  { %2669 = vadd.xlane.f32.xlu1 %v2668_v35 }
0x179f   :  { %2827 = vrot.lane.b32.xlu1 %v5482_v27, %s4965_s19 }
0x17a0   :  { %2907 = vrot.lane.b32.xlu0 %v5480_v25, %s4964_s18 }
0x17a4   :  { %2905 = vrot.lane.b32.xlu0 %v5480_v25, %s4965_s19 }
0x1817   :  { %v2667_v37 = vpop.xlane.xlu0 %2666 }
0x1818   :  { %4899 = vrcp.f32 %v2667_v37 }
0x181b   :  { %v2670_v38 = vpop.xlane.xlu1 %2669  ;;  %v2908_v0 = vpop.permute.xlu0 %2907 }
0x181c   :  { %4901 = vrcp.f32 %v2670_v38 }
0x181f   :  { %v2828_v28 = vpop.permute.xlu1 %2827  ;;  %v2906_v42 = vpop.permute.xlu0 %2905 }
0x1822   :  { %v4900_v39 = vpop.eup %4899 }
0x1823   :  { %v2673_v40 = vmul.f32 %v4900_v39, %v4896_v32 }
0x1825   :  { %4543 = vmatmul.mubr.msk.f32.vlgmr.msra.gmra.mrb[20].mxu0 %vm309_vm5, %v2673_v40 }
0x1826   :  { %v4902_v1 = vpop.eup %4901  ;;  %4551 = vmatpush3.xpose.msk.msra.mxu0 %vm309_vm5, %v2830_v36  ;;  %4552 = vmatprep.mubr.msk.f32.mxu0 %vm4957_vm4, %v4956_v15 }
0x1827   :  { %v2674_v41 = vmul.f32 %v4902_v1, %v4898_v34  ;;  %4560 = vmatprep.subr.mxu0 %v4956_v15 }
0x1829   :  { %4548 = vmatmul.mubr.msk.f32.vlgmr.msra.gmra.mrb[36].mxu1 %vm309_vm5, %v2674_v41  ;;  %4553 = vmatmul.mubr.msk.f32.vlgmr.msra.gmra.mrb[22].mxu0 %vm309_vm5, %v2828_v28 }
0x182a   :  { %4556 = vmatpush3.xpose.msk.msra.mxu1 %vm309_vm5, %v2908_v0  ;;  %4557 = vmatprep.mubr.msk.f32.mxu1 %vm4957_vm4, %v4956_v15 }
0x182b   :  { %4565 = vmatprep.subr.mxu1 %v4956_v15  ;;  %4562 = vmatprep.mubr.msk.f32.mxu0 %vm4957_vm4, %v4956_v15 }
0x182d   :  { %4558 = vmatmul.mubr.msk.f32.vlgmr.msra.gmra.mrb[38].mxu1 %vm309_vm5, %v2906_v42 }
0x182e   :  { %4567 = vmatprep.mubr.msk.f32.mxu1 %vm4957_vm4, %v4956_v15 }
0x18f8   :  { %v5576_v30 = vpop.f32.mrb[20].mxu0 }
0x18f9   :  { %v4544_v45 = vpop.f32.mrb[21].mxu0 }
0x18fc   :  { %v5578_v47 = vpop.f32.mrb[36].mxu1  ;;  %v2901_v49 = vpop.f32.mrb[22].mxu0 }
0x18fd   :  { %v2983_v50 = vmul.f32 0.35355338, %v2901_v49  ;;  %v4549_v51 = vpop.f32.mrb[37].mxu1  ;;  %v4554_v52 = vpop.f32.mrb[23].mxu0 }
0x18ff   :  { %v2985_v53 = vadd.f32 %v2983_v50, %v5186_v6 }
0x1900   :  { %v2979_v12 = vpop.f32.mrb[38].mxu1 }
0x1901   :  { %v2984_v54 = vmul.f32 0.35355338, %v2979_v12  ;;  %v4559_v55 = vpop.f32.mrb[39].mxu1  ;;  %v2987_v48 = vsel %vm309_vm5, %v2985_v53, -inf }
0x1902   :  { %2988 = vmax.xlane.f32.xlu1 %v2987_v48 }
0x1903   :  { %v2986_v56 = vadd.f32 %v2984_v54, %v5186_v6 }
0x1905   :  { %v2990_v57 = vsel %vm309_vm5, %v2986_v56, -inf }
0x1906   :  { %2991 = vmax.xlane.f32.xlu0 %v2990_v57  ;;  %v4127_v57 = vld [vmem:[%s5795_s7 + $0x28] sm:$0xff] }
0x1913   :  { %3085 = vrot.lane.b32.xlu1 %v5480_v25, %s5829_s4 }
0x1917   :  { %3163 = vrot.lane.b32.xlu1 %v5482_v27, %s5830_s6 }
0x191c   :  { %3009 = vrot.lane.b32.xlu0 %v5482_v27, %s5829_s4 }
0x198f   :  { %v2989_v58 = vpop.xlane.xlu1 %2988 }
0x1990   :  { %v2993_v59 = vsub.f32 %v2985_v53, %v2989_v58 }
0x1992   :  { %v2995_v60 = vmul.f32 1.442695, %v2993_v59  ;;  %v4128_v59 = vld [vmem:[%s5795_s7 + $0x30] sm:$0xff] }
0x1993   :  { %v3086_v61 = vpop.permute.xlu1 %3085  ;;  %v2992_v63 = vpop.xlane.xlu0 %2991 }
0x1994   :  { %4903 = vpow2.f32 %v2995_v60  ;;  %v2994_v3 = vsub.f32 %v2986_v56, %v2992_v63  ;;  %4566 = vmatpush3.msra.mxu1 %v3086_v61  ;;  %v4129_v60 = vld [vmem:[%s5795_s7 + $0x38] sm:$0xff] }
0x1995   :  { %4575 = vmatprep.subr.mxu1 %v4956_v15  ;;  %v4750_v61 = vpack.c.bf16 %v4129_v60, %v4128_v59 }
0x1996   :  { %v2997_v46 = vmul.f32 1.442695, %v2994_v3 }
0x1997   :  { %v3010_v4 = vpop.permute.xlu0 %3009  ;;  %v3164_v18 = vpop.permute.xlu1 %3163 }
0x1998   :  { %4905 = vpow2.f32 %v2997_v46  ;;  %4561 = vmatpush3.msra.mxu0 %v3010_v4 }
0x1999   :  { %4570 = vmatprep.subr.mxu0 %v4956_v15 }
0x199e   :  { %v4904_v5 = vpop.eup %4903 }
0x199f   :  { %v2999_v9 = vsel %vm309_vm5, %v4904_v5, 0.0 }
0x19a0   :  { %3000 = vadd.xlane.f32.xlu0 %v2999_v9 }
0x19a2   :  { %v4906_v10 = vpop.eup %4905 }
0x19a3   :  { %v3002_v13 = vsel %vm309_vm5, %v4906_v10, 0.0 }
0x19a4   :  { %3003 = vadd.xlane.f32.xlu1 %v3002_v13 }
0x19b5   :  { %3161 = vrot.lane.b32.xlu1 %v5482_v27, %s5831_s29 }
0x19b6   :  { %3241 = vrot.lane.b32.xlu0 %v5480_v25, %s5830_s6 }
0x19ba   :  { %3239 = vrot.lane.b32.xlu0 %v5480_v25, %s5831_s29 }
0x1a2d   :  { %v3001_v19 = vpop.xlane.xlu0 %3000 }
0x1a2e   :  { %4907 = vrcp.f32 %v3001_v19 }
0x1a31   :  { %v3004_v20 = vpop.xlane.xlu1 %3003  ;;  %v3242_v26 = vpop.permute.xlu0 %3241 }
0x1a32   :  { %4909 = vrcp.f32 %v3004_v20 }
0x1a35   :  { %v3162_v23 = vpop.permute.xlu1 %3161  ;;  %v3240_v24 = vpop.permute.xlu0 %3239 }
0x1a38   :  { %v4908_v21 = vpop.eup %4907 }
0x1a39   :  { %v3007_v22 = vmul.f32 %v4908_v21, %v4904_v5 }
0x1a3b   :  { %4563 = vmatmul.mubr.msk.f32.vlgmr.msra.gmra.mrb[24].mxu0 %vm309_vm5, %v3007_v22 }
0x1a3c   :  { %v4910_v16 = vpop.eup %4909  ;;  %4571 = vmatpush3.xpose.msk.msra.mxu0 %vm309_vm5, %v3164_v18  ;;  %4572 = vmatprep.mubr.msk.f32.mxu0 %vm4957_vm4, %v4956_v15 }
0x1a3d   :  { %v3008_v17 = vmul.f32 %v4910_v16, %v4906_v10  ;;  %4580 = vmatprep.subr.mxu0 %v4956_v15 }
0x1a3f   :  { %4568 = vmatmul.mubr.msk.f32.vlgmr.msra.gmra.mrb[40].mxu1 %vm309_vm5, %v3008_v17  ;;  %4573 = vmatmul.mubr.msk.f32.vlgmr.msra.gmra.mrb[26].mxu0 %vm309_vm5, %v3162_v23 }
0x1a40   :  { %4576 = vmatpush3.xpose.msk.msra.mxu1 %vm309_vm5, %v3242_v26  ;;  %4577 = vmatprep.mubr.msk.f32.mxu1 %vm4957_vm4, %v4956_v15 }
0x1a41   :  { %4585 = vmatprep.subr.mxu1 %v4956_v15  ;;  %4582 = vmatprep.mubr.msk.f32.mxu0 %vm4957_vm4, %v4956_v15 }
0x1a43   :  { %4578 = vmatmul.mubr.msk.f32.vlgmr.msra.gmra.mrb[42].mxu1 %vm309_vm5, %v3240_v24 }
0x1a44   :  { %4587 = vmatprep.mubr.msk.f32.mxu1 %vm4957_vm4, %v4956_v15 }
0x1b0e   :  { %v3081_v29 = vpop.f32.mrb[24].mxu0 }
0x1b0f   :  { %v4564_v31 = vpop.f32.mrb[25].mxu0 }
0x1b12   :  { %v3157_v32 = vpop.f32.mrb[40].mxu1  ;;  %v3235_v33 = vpop.f32.mrb[26].mxu0 }
0x1b13   :  { %v3317_v34 = vmul.f32 0.35355338, %v3235_v33  ;;  %v4569_v35 = vpop.f32.mrb[41].mxu1  ;;  %v4574_v36 = vpop.f32.mrb[27].mxu0 }
0x1b15   :  { %v3319_v37 = vadd.f32 %v3317_v34, %v5186_v6 }
0x1b16   :  { %v3313_v38 = vpop.f32.mrb[42].mxu1 }
0x1b17   :  { %v3318_v39 = vmul.f32 0.35355338, %v3313_v38  ;;  %v4579_v40 = vpop.f32.mrb[43].mxu1  ;;  %v3321_v1 = vsel %vm309_vm5, %v3319_v37, -inf }
0x1b18   :  { %3322 = vmax.xlane.f32.xlu1 %v3321_v1 }
0x1b19   :  { %v3320_v0 = vadd.f32 %v3318_v39, %v5186_v6 }
0x1b1b   :  { %v3324_v41 = vsel %vm309_vm5, %v3320_v0, -inf }
0x1b1c   :  { %3325 = vmax.xlane.f32.xlu0 %v3324_v41  ;;  %v4138_v41 = vld [vmem:[%s5799_s11 + $0x20] sm:$0xff] }
0x1ba5   :  { %v3323_v15 = vpop.xlane.xlu1 %3322 }
0x1ba6   :  { %v3327_v28 = vsub.f32 %v3319_v37, %v3323_v15  ;;  %v4139_v15 = vld [vmem:[%s5799_s11 + $0x28] sm:$0xff] }
0x1ba8   :  { %v3329_v42 = vmul.f32 1.442695, %v3327_v28  ;;  %v4754_v28 = vpack.c.bf16 %v4139_v15, %v4138_v41 }
0x1ba9   :  { %v3326_v45 = vpop.xlane.xlu0 %3325 }
0x1baa   :  { %4911 = vpow2.f32 %v3329_v42  ;;  %v3328_v49 = vsub.f32 %v3320_v0, %v3326_v45  ;;  %v4140_v42 = vld [vmem:[%s5799_s11 + $0x30] sm:$0xff]  ;;  %v4141_v45 = vld [vmem:[%s5799_s11 + $0x38] sm:$0xff] }
0x1bac   :  { %v3331_v50 = vmul.f32 1.442695, %v3328_v49  ;;  %v4758_v49 = vpack.c.bf16 %v4141_v45, %v4140_v42 }
0x1bae   :  { %4913 = vpow2.f32 %v3331_v50  ;;  %v4146_v50 = vld [vmem:[%s5801_s13 + $0x80] sm:$0xff] }
0x1bb4   :  { %v4912_v51 = vpop.eup %4911 }
0x1bb5   :  { %v3333_v52 = vsel %vm309_vm5, %v4912_v51, 0.0 }
0x1bb6   :  { %3334 = vadd.xlane.f32.xlu0 %v3333_v52 }
0x1bb8   :  { %v4914_v53 = vpop.eup %4913 }
0x1bb9   :  { %v3336_v12 = vsel %vm309_vm5, %v4914_v53, 0.0 }
0x1bba   :  { %3337 = vadd.xlane.f32.xlu1 %v3336_v12 }
0x1bcb   :  { %3419 = vrot.lane.b32.xlu1 %v5480_v25, %s5832_s12 }
0x1bcc   :  { %3343 = vrot.lane.b32.xlu0 %v5482_v27, %s5832_s12 }
0x1bcf   :  { %3497 = vrot.lane.b32.xlu1 %v5576_v30, %s5833_s0 }
0x1bd0   :  { %3499 = vrot.lane.b32.xlu0 %v5578_v47, %s5833_s0  ;;  %v4126_v47 = vld [vmem:[%s5795_s7 + $0x20] sm:$0xff] }
0x1bd1   :  { %v4746_v58 = vpack.c.bf16 %v4127_v57, %v4126_v47  ;;  %v4137_v57 = vld [vmem:[%s5798_s10 + $0x1] ss:$0 sm:$0xff] }
0x1bd3   :  { %3505 = vrot.lane.b32.xlu1 %v3081_v29, %s5834_s2 }
0x1bd4   :  { %3507 = vrot.lane.b32.xlu0 %v3157_v32, %s5834_s2 }
0x1c43   :  { %v3335_v6 = vpop.xlane.xlu0 %3334 }
0x1c44   :  { %4915 = vrcp.f32 %v3335_v6 }
0x1c47   :  { %v3338_v54 = vpop.xlane.xlu1 %3337  ;;  %v3344_v55 = vpop.permute.xlu0 %3343 }
0x1c48   :  { %4917 = vrcp.f32 %v3338_v54  ;;  %4581 = vmatpush3.msra.mxu0 %v3344_v55 }
0x1c49   :  { %4747 = vmatprep.subr.bf16.mxu0 %v4746_v58 }
0x1c4b   :  { %v3420_v25 = vpop.permute.xlu1 %3419  ;;  %v3500_v9 = vpop.permute.xlu0 %3499 }
0x1c4c   :  { %4586 = vmatpush3.msra.mxu1 %v3420_v25  ;;  %v3520_v22 = vsel %vm309_vm5, %v5538_v2, %v3500_v9 }
0x1c4d   :  { %4755 = vmatprep.subr.bf16.mxu1 %v4754_v28 }
0x1c4e   :  { %v4916_v48 = vpop.eup %4915 }
0x1c4f   :  { %v3341_v27 = vmul.f32 %v4916_v48, %v4912_v51  ;;  %v3498_v5 = vpop.permute.xlu1 %3497  ;;  %v3508_v18 = vpop.permute.xlu0 %3507  ;;  %v4147_v51 = vld [vmem:[%s5801_s13 + $0x88] sm:$0xff] }
0x1c50   :  { %v3519_v13 = vsel %vm309_vm5, %v5536_v62, %v3498_v5  ;;  %v3522_v16 = vsel %vm1667_vm8, %v3520_v22, %v3508_v18  ;;  %v4131_v62 = vld [vmem:[%s5796_s8 + $0x1] ss:$0 sm:$0xff]  ;;  %v4762_v52 = vpack.c.bf16 %v4147_v51, %v4146_v50  ;;  %v4151_v5 = vld [vmem:[%s5801_s13 + $0xa8] sm:$0xff]  ;;  %v4156_v22 = vld [vmem:[%s5801_s13 + $0xd0] sm:$0xff] }
0x1c51   :  { %4583 = vmatmul.mubr.msk.f32.vlgmr.msra.gmra.mrb[28].mxu0 %vm309_vm5, %v3341_v27  ;;  %v4136_v27 = vld [vmem:[%s5797_s9 + $0x1] ss:$0 sm:$0xff] }
0x1c52   :  { %v4918_v30 = vpop.eup %4917  ;;  %4749 = vmatpush3.bf16.msra.mxu0 %v4746_v58 }
0x1c53   :  { %v3342_v56 = vmul.f32 %v4918_v30, %v4914_v53  ;;  %4751 = vmatprep.subr.bf16.mxu0 %v4750_v61  ;;  %v3506_v10 = vpop.permute.xlu1 %3505 }
0x1c54   :  { %v3521_v19 = vsel %vm1667_vm8, %v3519_v13, %v3506_v10  ;;  %v4152_v10 = vld [vmem:[%s5801_s13 + $0xb0] sm:$0xff]  ;;  %v4153_v13 = vld [vmem:[%s5801_s13 + $0xb8] sm:$0xff] }
0x1c55   :  { %4588 = vmatmul.mubr.msk.f32.vlgmr.msra.gmra.mrb[44].mxu1 %vm309_vm5, %v3342_v56  ;;  %v4774_v18 = vpack.c.bf16 %v4153_v13, %v4152_v10  ;;  %v4164_v10 = vld [vmem:[%s5803_s15] ss:$0 sm:$0xff]  ;;  %s4931_s15 = scalar_lea.vmem %s4038_s25, 256 }
0x1c56   :  { %4753 = vmatpush3.bf16.msra.mxu0 %v4750_v61  ;;  %4757 = vmatpush3.bf16.msra.mxu1 %v4754_v28  ;;  %p4932_p0 = scmp.ne.s32.totalorder %s4038_s25, %s4931_s15  ;;  %p4937_p2 = scmp.lt.s32.totalorder %s4931_s15, %s4931_s15 }
0x1c57   :  { %4759 = vmatprep.subr.bf16.mxu1 %v4758_v49  ;;  %4763 = vmatprep.subr.bf16.mxu0 %v4762_v52 }
0x1c58   :  { %p4938_p3 = por %p4937_p2, %p4936_p1 }
0x1c5a   :  { %4761 = vmatpush3.bf16.msra.mxu1 %v4758_v49  ;;  %p4939_p4 = pnand %p4938_p3, %p4932_p0 }
0x1c5b   :  { %4796 = vmatprep.subr.msk.bf16.mxu1 %vm4795_vm9, %v5083_v7 }
0x1d24   :  { %v3415_v63 = vpop.f32.mrb[28].mxu0 }
0x1d25   :  { %3513 = vrot.lane.b32.xlu1 %v3415_v63, %s5835_s20  ;;  %v4584_v3 = vpop.f32.mrb[29].mxu0  ;;  %v4148_v63 = vld [vmem:[%s5801_s13 + $0x90] sm:$0xff] }
0x1d26   :  { %v4149_v3 = vld [vmem:[%s5801_s13 + $0x98] sm:$0xff] }
0x1d28   :  { %v3491_v46 = vpop.f32.mrb[44].mxu1 }
0x1d29   :  { %3515 = vrot.lane.b32.xlu0 %v3491_v46, %s5835_s20  ;;  %v4589_v4 = vpop.f32.mrb[45].mxu1  ;;  %v4766_v46 = vpack.c.bf16 %v4149_v3, %v4148_v63 }
0x1d2a   :  { %v4150_v4 = vld [vmem:[%s5801_s13 + $0xa0] sm:$0xff] }
0x1d2b   :  { %v4770_v9 = vpack.c.bf16 %v4151_v5, %v4150_v4 }
0x1d97   :  { %v3514_v20 = vpop.permute.xlu1 %3513 }
0x1d98   :  { %v3523_v21 = vsel %vm1670_vm7, %v3521_v19, %v3514_v20  ;;  %v4154_v19 = vld [vmem:[%s5801_s13 + $0xc0] sm:$0xff]  ;;  %v4155_v20 = vld [vmem:[%s5801_s13 + $0xc8] sm:$0xff] }
0x1d99   :  { %4598 = vmatprep.mubr.msk.f32.mxu0 %vm170_vm3, %v3523_v21  ;;  %v4778_v21 = vpack.c.bf16 %v4155_v20, %v4154_v19  ;;  %v4165_v20 = vld [vmem:[%s5804_s16] ss:$0 sm:$0xff] }
0x1d9b   :  { %v3516_v26 = vpop.permute.xlu0 %3515 }
0x1d9c   :  { %v3524_v17 = vsel %vm1670_vm7, %v3522_v16, %v3516_v26  ;;  %v4157_v16 = vld [vmem:[%s5801_s13 + $0xd8] sm:$0xff] }
0x1d9d   :  { %4599 = vmatmul.mubr.msk.f32.vlgmr.msra.gmra.mrb[30].mxu0 %vm170_vm3, %v3524_v17  ;;  %v4782_v26 = vpack.c.bf16 %v4157_v16, %v4156_v22  ;;  %v4158_v17 = vld [vmem:[%s5801_s13 + $0xe0] sm:$0xff] }
0x1d9e   :  { %4765 = vmatpush3.bf16.msra.mxu0 %v4762_v52 }
0x1d9f   :  { %4767 = vmatprep.subr.bf16.mxu0 %v4766_v46 }
0x1da2   :  { %4769 = vmatpush3.bf16.msra.mxu0 %v4766_v46 }
0x1da3   :  { %4771 = vmatprep.subr.bf16.mxu0 %v4770_v9 }
0x1da6   :  { %4773 = vmatpush3.bf16.msra.mxu0 %v4770_v9 }
0x1da7   :  { %4775 = vmatprep.subr.bf16.mxu0 %v4774_v18 }
0x1daa   :  { %4777 = vmatpush3.bf16.msra.mxu0 %v4774_v18 }
0x1dab   :  { %4779 = vmatprep.subr.bf16.mxu0 %v4778_v21 }
0x1dae   :  { %4781 = vmatpush3.bf16.msra.mxu0 %v4778_v21 }
0x1daf   :  { %4783 = vmatprep.subr.bf16.mxu0 %v4782_v26 }
0x1db2   :  { %4785 = vmatpush3.bf16.msra.mxu0 %v4782_v26 }
0x1e70   :  { %v4600_v23 = vpop.f32.mrb[30].mxu0 }
0x1e71   :  { %v3616_v24 = vadd.f32 %v4600_v23, %v4131_v62  ;;  %v3610_v29 = vpop.f32.mrb[31].mxu0 }
0x1e72   :  { %v3611_v31 = vadd.f32 %v4131_v62, %v3610_v29  ;;  %v4159_v62 = vld [vmem:[%s5801_s13 + $0xe8] sm:$0xff]  ;;  %v4161_v29 = vld [vmem:[%s5801_s13 + $0xf8] sm:$0xff] }
0x1e73   :  { %v5662_v32 = vadd.f32 %v3616_v24, %v5441_v43  ;;  %v4786_v23 = vpack.c.bf16 %v4159_v62, %v4158_v17  ;;  %v4160_v24 = vld [vmem:[%s5801_s13 + $0xf0] sm:$0xff] }
0x1e74   :  { %v5665_v2 = vadd.f32 %v3611_v31, %v5444_v44  ;;  %v4790_v31 = vpack.c.bf16 %v4161_v29, %v4160_v24 }
0x1e75   :  { %v3628_v33 = vsel %vm170_vm3, %v5662_v32, 0.0  ;;  %4787 = vmatprep.subr.bf16.mxu0 %v4786_v23 }
0x1e76   :  { %3629 = vadd.xlane.f32.xlu0 %v3628_v33  ;;  %v3625_v34 = vsel %vm170_vm3, %v5665_v2, 0.0  ;;  %4789 = vmatpush3.bf16.msra.mxu0 %v4786_v23  ;;  %v4143_v33 = vld [vmem:[%s5828_s26 + $0x1] ss:$0 sm:$0xff] }
0x1e77   :  { %3626 = vadd.xlane.f32.xlu1 %v3625_v34  ;;  %4791 = vmatprep.subr.bf16.mxu0 %v4790_v31 }
0x1e7a   :  { %4793 = vmatpush3.bf16.msra.mxu0 %v4790_v31 }
0x1f03   :  { %v3630_v35 = vpop.xlane.xlu0 %3629 }
0x1f04   :  { %v3632_v36 = vmul.f32 0.03125, %v3630_v35  ;;  %v3627_v37 = vpop.xlane.xlu1 %3626 }
0x1f05   :  { %v3631_v38 = vmul.f32 0.03125, %v3627_v37 }
0x1f06   :  { %v3634_v39 = vsub.f32 %v5662_v32, %v3632_v36 }
0x1f07   :  { %v3633_v43 = vsub.f32 %v5665_v2, %v3631_v38 }
0x1f08   :  { %v3636_v40 = vmul.f32 %v3634_v39, %v3634_v39 }
0x1f09   :  { %v3635_v1 = vmul.f32 %v3633_v43, %v3633_v43 }
0x1f0a   :  { %v3640_v44 = vsel %vm170_vm3, %v3636_v40, 0.0 }
0x1f0b   :  { %3641 = vadd.xlane.f32.xlu1 %v3640_v44  ;;  %v3637_v0 = vsel %vm170_vm3, %v3635_v1, 0.0 }
0x1f0c   :  { %3638 = vadd.xlane.f32.xlu0 %v3637_v0 }
0x1f98   :  { %v3642_v53 = vpop.xlane.xlu1 %3641 }
0x1f99   :  { %v3644_v12 = vmul.f32 0.03125, %v3642_v53  ;;  %v3639_v6 = vpop.xlane.xlu0 %3638 }
0x1f9a   :  { %v3643_v54 = vmul.f32 0.03125, %v3639_v6  ;;  %v4163_v6 = vld [vmem:[%s5802_s14 + $0x1] ss:$0 sm:$0xff] }
0x1f9b   :  { %v3646_v55 = vadd.f32 1e-05, %v3644_v12 }
0x1f9c   :  { %v3645_v25 = vadd.f32 1e-05, %v3643_v54 }
0x1f9d   :  { %4919 = vrsqrt.f32 %v3646_v55 }
0x1f9e   :  { %4921 = vrsqrt.f32 %v3645_v25 }
0x1fa7   :  { %v4920_v48 = vpop.eup %4919 }
0x1fa8   :  { %v4922_v30 = vpop.eup %4921  ;;  %v3650_v56 = vmul.f32 %v4920_v48, %v3634_v39 }
0x1fa9   :  { %v3649_v47 = vmul.f32 %v4922_v30, %v3633_v43 }
0x1faa   :  { %v3658_v58 = vmul.f32 %v4136_v27, %v3650_v56 }
0x1fab   :  { %v3657_v59 = vmul.f32 %v4136_v27, %v3649_v47 }
0x1fac   :  { %v3666_v61 = vadd.f32 %v4137_v57, %v3658_v58 }
0x1fad   :  { %v3665_v60 = vadd.f32 %v4137_v57, %v3657_v59 }
0x1faf   :  { %4609 = vmatprep.mubr.msk.f32.mxu1 %vm170_vm3, %v3665_v60 }
0x1fb0   :  { %4610 = vmatmul.mubr.msk.f32.vlgmr.msra.gmra.mrb[46].mxu1 %vm170_vm3, %v3666_v61 }
0x1fb1   :  { %4799 = vmatpush3.bf16.xpose.msk.msra.mxu1 %vm4795_vm9, %v5083_v7 }
0x1fb2   :  { %4802 = vmatprep.subr.msk.bf16.mxu1 %vm4795_vm9, %v5085_v8 }
0x1fb9   :  { %4805 = vmatpush3.bf16.xpose.msk.msra.mxu1 %vm4795_vm9, %v5085_v8 }
0x1fba   :  { %4808 = vmatprep.subr.msk.bf16.mxu1 %vm4795_vm9, %v5096_v11 }
0x1fc1   :  { %4811 = vmatpush3.bf16.xpose.msk.msra.mxu1 %vm4795_vm9, %v5096_v11 }
0x1fc2   :  { %4814 = vmatprep.subr.msk.bf16.mxu1 %vm4795_vm9, %v5106_v14 }
0x1fc9   :  { %4817 = vmatpush3.bf16.xpose.msk.msra.mxu1 %vm4795_vm9, %v5106_v14 }
0x2083   :  { %v4611_v34 = vpop.f32.mrb[46].mxu1 }
0x2084   :  { %v3758_v35 = vadd.f32 %v4611_v34, %v4143_v33  ;;  %v3752_v36 = vpop.f32.mrb[47].mxu1 }
0x2085   :  { %v3753_v37 = vadd.f32 %v4143_v33, %v3752_v36 }
0x2086   :  { %v3764_v38 = vmul.f32 0.044715, %v3758_v35  ;;  %v3762_v52 = vmul.f32 0.5, %v3758_v35 }
0x2087   :  { %v3763_v39 = vmul.f32 0.044715, %v3753_v37  ;;  %v3761_v50 = vmul.f32 0.5, %v3753_v37 }
0x2088   :  { %v3766_v43 = vmul.f32 %v3764_v38, %v3758_v35 }
0x2089   :  { %v3765_v40 = vmul.f32 %v3763_v39, %v3753_v37 }
0x208a   :  { %v3768_v1 = vmul.f32 %v3766_v43, %v3758_v35 }
0x208b   :  { %v3767_v44 = vmul.f32 %v3765_v40, %v3753_v37 }
0x208c   :  { %v3770_v0 = vadd.f32 %v3768_v1, %v3758_v35 }
0x208d   :  { %v3769_v41 = vadd.f32 %v3767_v44, %v3753_v37 }
0x208e   :  { %v3772_v15 = vmul.f32 0.7978846, %v3770_v0 }
0x208f   :  { %v3771_v28 = vmul.f32 0.7978846, %v3769_v41 }
0x2090   :  { %4923 = vtanh.f32 %v3772_v15 }
0x2091   :  { %4925 = vtanh.f32 %v3771_v28 }
0x209a   :  { %v4924_v42 = vpop.eup %4923 }
0x209b   :  { %v4926_v45 = vpop.eup %4925  ;;  %v3776_v49 = vadd.f32 1.0, %v4924_v42 }
0x209c   :  { %v3775_v51 = vadd.f32 1.0, %v4926_v45 }
0x209d   :  { %v3778_v12 = vmul.f32 %v3776_v49, %v3762_v52 }
0x209e   :  { %v3777_v53 = vmul.f32 %v3775_v51, %v3761_v50 }
0x20a0   :  { %4644 = vmatprep.mubr.f32.mxu0 %v3777_v53 }
0x20a1   :  { %4645 = vmatmul.mubr.f32.vlgmr.msra.gmra.mrb[32].mxu0 %v3778_v12 }
0x2174   :  { %v4646_v54 = vpop.f32.mrb[32].mxu0 }
0x2175   :  { %v3876_v55 = vadd.f32 %v4646_v54, %v4163_v6  ;;  %v3870_v25 = vpop.f32.mrb[33].mxu0 }
0x2176   :  { %v3871_v48 = vadd.f32 %v4163_v6, %v3870_v25 }
0x2177   :  { %v3880_v27 = vadd.f32 %v3876_v55, %v5662_v32 }
0x2178   :  { %v3879_v30 = vadd.f32 %v3871_v48, %v5665_v2 }
0x2179   :  { %v3886_v56 = vsel %vm170_vm3, %v3880_v27, 0.0 }
0x217a   :  { %3887 = vadd.xlane.f32.xlu1 %v3886_v56  ;;  %v3883_v47 = vsel %vm170_vm3, %v3879_v30, 0.0 }
0x217b   :  { %3884 = vadd.xlane.f32.xlu0 %v3883_v47 }
0x2207   :  { %v3888_v32 = vpop.xlane.xlu1 %3887 }
0x2208   :  { %v3890_v2 = vmul.f32 0.03125, %v3888_v32  ;;  %v3885_v57 = vpop.xlane.xlu0 %3884 }
0x2209   :  { %v3889_v58 = vmul.f32 0.03125, %v3885_v57 }
0x220a   :  { %v3892_v59 = vsub.f32 %v3880_v27, %v3890_v2 }
0x220b   :  { %v3891_v60 = vsub.f32 %v3879_v30, %v3889_v58 }
0x220c   :  { %v3894_v61 = vmul.f32 %v3892_v59, %v3892_v59 }
0x220d   :  { %v3893_v7 = vmul.f32 %v3891_v60, %v3891_v60 }
0x220e   :  { %v3898_v63 = vsel %vm170_vm3, %v3894_v61, 0.0 }
0x220f   :  { %3899 = vadd.xlane.f32.xlu1 %v3898_v63  ;;  %v3895_v8 = vsel %vm170_vm3, %v3893_v7, 0.0 }
0x2210   :  { %3896 = vadd.xlane.f32.xlu0 %v3895_v8 }
0x229c   :  { %v3900_v3 = vpop.xlane.xlu1 %3899 }
0x229d   :  { %v3902_v11 = vmul.f32 0.03125, %v3900_v3  ;;  %v3897_v46 = vpop.xlane.xlu0 %3896 }
0x229e   :  { %v3901_v4 = vmul.f32 0.03125, %v3897_v46 }
0x229f   :  { %v3904_v5 = vadd.f32 1e-05, %v3902_v11 }
0x22a0   :  { %v3903_v14 = vadd.f32 1e-05, %v3901_v4 }
0x22a1   :  { %4927 = vrsqrt.f32 %v3904_v5 }
0x22a2   :  { %4929 = vrsqrt.f32 %v3903_v14 }
0x22ab   :  { %v4928_v9 = vpop.eup %4927 }
0x22ac   :  { %v4930_v13 = vpop.eup %4929  ;;  %v3908_v18 = vmul.f32 %v4928_v9, %v3892_v59 }
0x22ad   :  { %v3907_v19 = vmul.f32 %v4930_v13, %v3891_v60 }
0x22ae   :  { %v3916_v21 = vmul.f32 %v4164_v10, %v3908_v18 }
0x22af   :  { %v3915_v22 = vmul.f32 %v4164_v10, %v3907_v19 }
0x22b0   :  { %v3924_v26 = vadd.f32 %v4165_v20, %v3916_v21 }
0x22b1   :  { %v3923_v16 = vadd.f32 %v4165_v20, %v3915_v22 }
0x22b3   :  { %4663 = vmatprep.mubr.msk.f32.mxu1 %vm170_vm3, %v3923_v16 }
0x22b4   :  { %4664 = vmatmul.mubr.msk.f32.vlgmr.msra.gmra.mrb[48].mxu1 %vm170_vm3, %v3924_v26 }
0x2387   :  { %v4665_v17 = vpop.f32.mrb[48].mxu1 }
0x2388   :  { %4031 = vst.msk [vmem:[#allocation2 + $0x8] sm:$0xff] %vm82_vm0, %v4665_v17  ;;  %v4021_v62 = vpop.f32.mrb[49].mxu1 }
0x2389   :  { %4030 = vst.msk [vmem:[#allocation2] sm:$0xff] %vm82_vm0, %v4021_v62 }
0x238a   :  { %4942 = shalt.err (!%p4939_p4)
}
0x238b   :  { %s4943_s3 = scalar_lea.hbm %s5805_s17, 256 }
0x238c   :  { %p4944_p5 = scmp.ne.s32.totalorder %s5805_s17, %s4943_s3  ;;  %p4947_p6 = scmp.lt.u32.totalorder %s4943_s3, %s5805_s17 }
0x238e   :  { %p4949_p7 = pnand %p4947_p6, %p4944_p5 }
0x2390   :  { %4952 = shalt.err (!%p4949_p7)
}
0x2391   :  { %s4974_s2 = smov 128  }
0x2392   :  { %4043 = dma.vmem_to_hbm [thread:$0]  %s4038_s25, 256, %s5805_s17, [#allocation3], %s4974_s2, %s4974_s2, %s5833_s0  }
0x2393   :  { %4953 = dma.done.wait [#allocation3], 256  }
0x2394   :  { %4954 = vsyncadd [#allocation3], 4294967040 }
0x2395   :  { %4047 = vsyncpa [#allocation3], 1 }

</bundles_post_ra>
